<compile_context>
chip_gen: v7x
topology: tpu7x:2x2x1
jax: 0.10.0
libtpu: 0.0.40
codegen_flags: <defaults>
</compile_context>

<pallas_src>
import jax
import jax.numpy as jnp
from jax.experimental import pallas as pl
from jax.experimental.pallas import tpu as pltpu


def _round_up8(v):
    return ((v + 7) // 8) * 8


def pack_params(params, C):
    """Fuse all six 1x1-conv weights/biases into one (R, 2C) slab + (R, 1) bias.

    Row layout (each segment start is a multiple of 8):
      [0           : 2*Cq      ]  block-diag(wq1, wq2)         -> pq
      [off_b1      : off_b1+C  ]  wv1  (cols [0:C])            -> v1
      [off_b1+C    : off_b1+C+8]  zeros, bias 1                 -> ones rows (colsum)
      [off_b1+C+8  : ...+Ck    ]  wk1  (cols [0:C])            -> k1
      [off_b2 ...              ]  same for branch 2 (cols [C:2C])
    """
    assert C % 8 == 0, "in_dim must be a multiple of 8 for sublane-aligned packing"
    Cq = C // 8
    Ck = C // 4
    off_b1 = _round_up8(2 * Cq)
    off_b2 = _round_up8(off_b1 + C + 8 + Ck)
    R = _round_up8(off_b2 + C + 8 + Ck)

    w = jnp.zeros((R, 2 * C), jnp.float32)
    b = jnp.zeros((R, 1), jnp.float32)

    # fused query projection (block diagonal over [x; y])
    w = w.at[0:Cq, 0:C].set(params["wq1"])
    w = w.at[Cq:2 * Cq, C:2 * C].set(params["wq2"])
    b = b.at[0:Cq].set(params["bq1"])
    b = b.at[Cq:2 * Cq].set(params["bq2"])

    def pack_branch(w, b, off, wv, bv, wk, bk, col0):
        w = w.at[off:off + C, col0:col0 + C].set(wv)
        b = b.at[off:off + C].set(bv)
        b = b.at[off + C:off + C + 8].set(1.0)          # ones rows: 0*input + 1
        w = w.at[off + C + 8:off + C + 8 + Ck, col0:col0 + C].set(wk)
        b = b.at[off + C + 8:off + C + 8 + Ck].set(bk)
        return w, b

    w, b = pack_branch(w, b, off_b1, params["wv1"], params["bv1"],
                       params["wk1"], params["bk1"], 0)
    w, b = pack_branch(w, b, off_b2, params["wv2"], params["bv2"],
                       params["wk2"], params["bk2"], C)
    return w, b, off_b1, off_b2


def make_kernel(C, Cq, Ck, off_b1, off_b2):
    nq = 2 * Cq

    def kernel(x_ref, y_ref, w_ref, b_ref, o1_ref, o2_ref):
        # Blocks are (1, C, N); squeeze the batch dim -> (C, N).
        x = x_ref[0]
        y = y_ref[0]

        # Single fused projection: one MXU launch produces pq, v1, ones, k1,
        # v2, ones, k2 at static sublane-aligned row offsets.
        xy = jnp.concatenate([x, y], axis=0)                               # (2C, N)
        proj = jnp.dot(w_ref[...], xy,
                       preferred_element_type=jnp.float32) + b_ref[...]    # (R, N)

        pq = proj[0:nq].astype(jnp.bfloat16)                               # (C//4, N)

        def branch(inp, off, o_ref):
            vaug = proj[off:off + C + 8]            # (C+8, N); rows [C:C+8] are 1s
            k = proj[off + C + 8:off + C + 8 + Ck]  # (C//4, N)

            # eT[j, i] = energy[i, j] = sum_c pq[c, i] * k[c, j]  (no .T anywhere)
            eT = jax.lax.dot_general(
                k.astype(jnp.bfloat16), pq, (((0,), (0,)), ((), ())),
                preferred_element_type=jnp.float32)                        # (N_j, N_i)

            # softmax over j (axis 0); normalization deferred past the matmul.
            m = jnp.max(eT, axis=0, keepdims=True)                         # (1, N)
            p = jnp.exp(eT - m)                                            # (N_j, N_i)

            # out_aug[:C] = v @ p (unnormalized attention output),
            # out_aug[C]  = column sums of p (softmax denominator) — one MXU pass.
            out_aug = jnp.dot(vaug.astype(jnp.bfloat16), p.astype(jnp.bfloat16),
                              preferred_element_type=jnp.float32)          # (C+8, N)

            inv = pl.reciprocal(out_aug[C:C + 1], approx=True)             # EUP, (1, N)
            o_ref[0] = (out_aug[:C] * inv + inp).astype(o_ref.dtype)       # lane-dense

        branch(x, off_b1, o1_ref)
        branch(y, off_b2, o2_ref)

    return kernel


def cross_attention(input1_nchw, input2_nchw, params):
    """params: conv weights (Cout, Cin), biases (Cout, 1), for q1/q2/k1/v1/k2/v2."""
    B, C, W, H = input1_nchw.shape
    N = W * H
    Cq, Ck = C // 8, C // 4
    # NOTE: N a multiple of 128 keeps stores unmasked; other N still correct.

    # NCHW -> (B, C, N): pure reshape, no transpose.
    x = input1_nchw.reshape(B, C, N)
    y = input2_nchw.reshape(B, C, N)

    w_pack, b_pack, off_b1, off_b2 = pack_params(params, C)
    R = w_pack.shape[0]

    kernel = make_kernel(C, Cq, Ck, off_b1, off_b2)

    in_specs = [
        pl.BlockSpec((1, C, N), lambda b: (b, 0, 0)),
        pl.BlockSpec((1, C, N), lambda b: (b, 0, 0)),
        pl.BlockSpec((R, 2 * C), lambda b: (0, 0)),
        pl.BlockSpec((R, 1), lambda b: (0, 0)),
    ]
    out_specs = [
        pl.BlockSpec((1, C, N), lambda b: (b, 0, 0)),
        pl.BlockSpec((1, C, N), lambda b: (b, 0, 0)),
    ]
    out_shape = [
        jax.ShapeDtypeStruct((B, C, N), jnp.float32),
        jax.ShapeDtypeStruct((B, C, N), jnp.float32),
    ]

    o1, o2 = pl.pallas_call(
        kernel,
        grid=(B,),
        in_specs=in_specs,
        out_specs=out_specs,
        out_shape=out_shape,
        compiler_params=pltpu.CompilerParams(
            dimension_semantics=("parallel",),       # B feeds both TCs on v7x
            vmem_limit_bytes=32 * 1024 * 1024),      # explicit, generation-safe
    )(x, y, w_pack, b_pack)

    # (B, C, N) -> NCHW: pure reshape, no transpose.
    return o1.reshape(B, C, W, H), o2.reshape(B, C, W, H)


def cross_attention_ref(input1_nchw, input2_nchw, params):
    """Pure-JAX f32 reference, same math as the PyTorch forward()."""
    B, C, W, H = input1_nchw.shape
    N = W * H
    x = input1_nchw.reshape(B, C, N)
    y = input2_nchw.reshape(B, C, N)

    def conv1x1(inp, w, b):                          # w (Cout, Cin), b (Cout, 1)
        return jnp.einsum("oc,bcn->bon", w, inp) + b

    q1 = conv1x1(x, params["wq1"], params["bq1"])    # (B, C//8, N)
    q2 = conv1x1(y, params["wq2"], params["bq2"])
    pq = jnp.concatenate([q1, q2], axis=1)           # (B, C//4, N)

    def branch(inp, wk, bk, wv, bv):
        k = conv1x1(inp, wk, bk)                     # (B, C//4, N)
        v = conv1x1(inp, wv, bv)                     # (B, C, N)
        energy = jnp.einsum("bci,bcj->bij", pq, k)   # (B, N, N)
        attn = jax.nn.softmax(energy, axis=-1)
        out = jnp.einsum("bcj,bij->bci", v, attn)    # (B, C, N)
        return out + inp

    o1 = branch(x, params["wk1"], params["bk1"], params["wv1"], params["bv1"])
    o2 = branch(y, params["wk2"], params["bk2"], params["wv2"], params["bv2"])
    return o1.reshape(B, C, W, H), o2.reshape(B, C, W, H)


def make_params(key, in_dim):
    Cq = in_dim // 8
    Ck = in_dim // 4
    names_shapes = [
        ("wq1", (Cq, in_dim)), ("bq1", (Cq, 1)),
        ("wq2", (Cq, in_dim)), ("bq2", (Cq, 1)),
        ("wk1", (Ck, in_dim)), ("bk1", (Ck, 1)),
        ("wv1", (in_dim, in_dim)), ("bv1", (in_dim, 1)),
        ("wk2", (Ck, in_dim)), ("bk2", (Ck, 1)),
        ("wv2", (in_dim, in_dim)), ("bv2", (in_dim, 1)),
    ]
    keys = jax.random.split(key, len(names_shapes))
    params = {}
    for (name, shape), k in zip(names_shapes, keys):
        params[name] = jax.random.normal(k, shape, dtype=jnp.float32) * 0.1
    return params


if __name__ == "__main__":
    B, C, W, H = 2, 32, 16, 16   # in_dim=32 -> C//8=4, C//4=8; N = 256

    key = jax.random.PRNGKey(0)
    k1, k2, kp = jax.random.split(key, 3)
    input1 = jax.random.normal(k1, (B, C, W, H), dtype=jnp.float32)
    input2 = jax.random.normal(k2, (B, C, W, H), dtype=jnp.float32)
    params = make_params(kp, C)

    out1, out2 = cross_attention(input1, input2, params)
    out1 = jax.block_until_ready(out1)
    out2 = jax.block_until_ready(out2)

    ref1, ref2 = cross_attention_ref(input1, input2, params)
    assert out1.shape == (B, C, W, H) and out2.shape == (B, C, W, H)
    # bf16 MXU operands + approx reciprocal vs f32 reference -> loosened tolerance.
    assert jnp.allclose(out1, ref1, atol=2e-2, rtol=2e-2)
    assert jnp.allclose(out2, ref2, atol=2e-2, rtol=2e-2)

    print("KERNEL_OK")
</pallas_src>

<mosaic_0001>
module attributes {stable_mosaic.version = 11 : i64} {
  func.func @kernel(%arg0: i32, %arg1: memref<1x32x256xf32, #tpu.memory_space<vmem>>, %arg2: memref<1x32x256xf32, #tpu.memory_space<vmem>>, %arg3: memref<104x64xf32, #tpu.memory_space<vmem>>, %arg4: memref<104x1xf32, #tpu.memory_space<vmem>>, %arg5: memref<1x32x256xf32, #tpu.memory_space<vmem>>, %arg6: memref<1x32x256xf32, #tpu.memory_space<vmem>>) attributes {dimension_semantics = [#tpu.dimension_semantics<parallel>], iteration_bounds = array<i64: 2>, scalar_prefetch = 0 : i64, scratch_operands = 0 : i64, tpu.core_type = #tpu.core_type<tc>, window_params = [{transform_indices = @transform_0, window_bounds = array<i64: 1, 32, 256>}, {transform_indices = @transform_1, window_bounds = array<i64: 1, 32, 256>}, {pipeline_mode = #tpu.pipeline_mode<synchronous>, transform_indices = @transform_2, window_bounds = array<i64: 104, 64>}, {pipeline_mode = #tpu.pipeline_mode<synchronous>, transform_indices = @transform_3, window_bounds = array<i64: 104, 1>}, {transform_indices = @transform_4, window_bounds = array<i64: 1, 32, 256>}, {transform_indices = @transform_5, window_bounds = array<i64: 1, 32, 256>}]} {
    %c0 = arith.constant 0 : index
    %c0_0 = arith.constant 0 : index
    %c0_1 = arith.constant 0 : index
    %0 = vector.load %arg1[%c0, %c0_0, %c0_1] : memref<1x32x256xf32, #tpu.memory_space<vmem>>, vector<1x32x256xf32>
    %1 = vector.shape_cast %0 : vector<1x32x256xf32> to vector<32x256xf32>
    %c0_2 = arith.constant 0 : index
    %c0_3 = arith.constant 0 : index
    %c0_4 = arith.constant 0 : index
    %2 = vector.load %arg2[%c0_2, %c0_3, %c0_4] : memref<1x32x256xf32, #tpu.memory_space<vmem>>, vector<1x32x256xf32>
    %3 = vector.shape_cast %2 : vector<1x32x256xf32> to vector<32x256xf32>
    %4 = tpu.concatenate %1, %3 in 0 : vector<32x256xf32>, vector<32x256xf32> -> vector<64x256xf32>
    %c0_5 = arith.constant 0 : index
    %c0_6 = arith.constant 0 : index
    %5 = vector.load %arg3[%c0_5, %c0_6] : memref<104x64xf32, #tpu.memory_space<vmem>>, vector<104x64xf32>
    %cst = arith.constant dense<0.000000e+00> : vector<104x256xf32>
    %6 = tpu.matmul %5, %4, %cst {dimension_numbers = #tpu.dot_dimension_numbers<[1], [0], [0], [1], [0, 0, 1, 1], [], []>} : vector<104x64xf32>, vector<64x256xf32>, vector<104x256xf32> -> vector<104x256xf32>
    %c0_7 = arith.constant 0 : index
    %c0_8 = arith.constant 0 : index
    %7 = vector.load %arg4[%c0_7, %c0_8] : memref<104x1xf32, #tpu.memory_space<vmem>>, vector<104x1xf32>
    %8 = vector.broadcast %7 : vector<104x1xf32> to vector<104x256xf32>
    %9 = arith.addf %6, %8 : vector<104x256xf32>
    %10 = vector.extract_strided_slice %9 {offsets = [0, 0], sizes = [8, 256], strides = [1, 1]} : vector<104x256xf32> to vector<8x256xf32>
    %11 = arith.truncf %10 : vector<8x256xf32> to vector<8x256xbf16>
    %12 = vector.extract_strided_slice %9 {offsets = [8, 0], sizes = [40, 256], strides = [1, 1]} : vector<104x256xf32> to vector<40x256xf32>
    %13 = vector.extract_strided_slice %9 {offsets = [48, 0], sizes = [8, 256], strides = [1, 1]} : vector<104x256xf32> to vector<8x256xf32>
    %14 = arith.truncf %13 : vector<8x256xf32> to vector<8x256xbf16>
    %cst_9 = arith.constant dense<0.000000e+00> : vector<256x256xf32>
    %15 = tpu.matmul %14, %11, %cst_9 {dimension_numbers = #tpu.dot_dimension_numbers<[0], [0], [1], [1], [0, 1, 1, 1], [], []>} : vector<8x256xbf16>, vector<8x256xbf16>, vector<256x256xf32> -> vector<256x256xf32>
    %cst_10 = arith.constant dense<0xFF800000> : vector<256xf32>
    %16 = vector.multi_reduction <maximumf>, %15, %cst_10 [0] : vector<256x256xf32> to vector<256xf32>
    %17 = vector.shape_cast %16 : vector<256xf32> to vector<1x256xf32>
    %18 = vector.broadcast %17 : vector<1x256xf32> to vector<256x256xf32>
    %19 = arith.subf %15, %18 : vector<256x256xf32>
    %20 = math.exp %19 : vector<256x256xf32>
    %21 = arith.truncf %12 : vector<40x256xf32> to vector<40x256xbf16>
    %22 = arith.truncf %20 : vector<256x256xf32> to vector<256x256xbf16>
    %cst_11 = arith.constant dense<0.000000e+00> : vector<40x256xf32>
    %23 = tpu.matmul %21, %22, %cst_11 {dimension_numbers = #tpu.dot_dimension_numbers<[1], [0], [0], [1], [0, 0, 1, 1], [], []>} : vector<40x256xbf16>, vector<256x256xbf16>, vector<40x256xf32> -> vector<40x256xf32>
    %24 = vector.extract_strided_slice %23 {offsets = [32, 0], sizes = [1, 256], strides = [1, 1]} : vector<40x256xf32> to vector<1x256xf32>
    %25 = tpu.reciprocal %24 {approx = true} : vector<1x256xf32> -> vector<1x256xf32>
    %26 = vector.extract_strided_slice %23 {offsets = [0, 0], sizes = [32, 256], strides = [1, 1]} : vector<40x256xf32> to vector<32x256xf32>
    %27 = vector.broadcast %25 : vector<1x256xf32> to vector<32x256xf32>
    %28 = arith.mulf %26, %27 : vector<32x256xf32>
    %29 = arith.addf %28, %1 : vector<32x256xf32>
    %c0_12 = arith.constant 0 : index
    %c0_13 = arith.constant 0 : index
    %c0_14 = arith.constant 0 : index
    %30 = vector.load %arg5[%c0_12, %c0_13, %c0_14] : memref<1x32x256xf32, #tpu.memory_space<vmem>>, vector<1x32x256xf32>
    %31 = vector.shape_cast %30 : vector<1x32x256xf32> to vector<32x256xf32>
    %32 = vector.shape_cast %29 : vector<32x256xf32> to vector<1x32x256xf32>
    tpu.vector_store %arg5[%c0_12, %c0_13, %c0_14], %32 {strides = array<i32>} : memref<1x32x256xf32, #tpu.memory_space<vmem>>, vector<1x32x256xf32>,
    %33 = vector.extract_strided_slice %9 {offsets = [56, 0], sizes = [40, 256], strides = [1, 1]} : vector<104x256xf32> to vector<40x256xf32>
    %34 = vector.extract_strided_slice %9 {offsets = [96, 0], sizes = [8, 256], strides = [1, 1]} : vector<104x256xf32> to vector<8x256xf32>
    %35 = arith.truncf %34 : vector<8x256xf32> to vector<8x256xbf16>
    %cst_15 = arith.constant dense<0.000000e+00> : vector<256x256xf32>
    %36 = tpu.matmul %35, %11, %cst_15 {dimension_numbers = #tpu.dot_dimension_numbers<[0], [0], [1], [1], [0, 1, 1, 1], [], []>} : vector<8x256xbf16>, vector<8x256xbf16>, vector<256x256xf32> -> vector<256x256xf32>
    %cst_16 = arith.constant dense<0xFF800000> : vector<256xf32>
    %37 = vector.multi_reduction <maximumf>, %36, %cst_16 [0] : vector<256x256xf32> to vector<256xf32>
    %38 = vector.shape_cast %37 : vector<256xf32> to vector<1x256xf32>
    %39 = vector.broadcast %38 : vector<1x256xf32> to vector<256x256xf32>
    %40 = arith.subf %36, %39 : vector<256x256xf32>
    %41 = math.exp %40 : vector<256x256xf32>
    %42 = arith.truncf %33 : vector<40x256xf32> to vector<40x256xbf16>
    %43 = arith.truncf %41 : vector<256x256xf32> to vector<256x256xbf16>
    %cst_17 = arith.constant dense<0.000000e+00> : vector<40x256xf32>
    %44 = tpu.matmul %42, %43, %cst_17 {dimension_numbers = #tpu.dot_dimension_numbers<[1], [0], [0], [1], [0, 0, 1, 1], [], []>} : vector<40x256xbf16>, vector<256x256xbf16>, vector<40x256xf32> -> vector<40x256xf32>
    %45 = vector.extract_strided_slice %44 {offsets = [32, 0], sizes = [1, 256], strides = [1, 1]} : vector<40x256xf32> to vector<1x256xf32>
    %46 = tpu.reciprocal %45 {approx = true} : vector<1x256xf32> -> vector<1x256xf32>
    %47 = vector.extract_strided_slice %44 {offsets = [0, 0], sizes = [32, 256], strides = [1, 1]} : vector<40x256xf32> to vector<32x256xf32>
    %48 = vector.broadcast %46 : vector<1x256xf32> to vector<32x256xf32>
    %49 = arith.mulf %47, %48 : vector<32x256xf32>
    %50 = arith.addf %49, %3 : vector<32x256xf32>
    %c0_18 = arith.constant 0 : index
    %c0_19 = arith.constant 0 : index
    %c0_20 = arith.constant 0 : index
    %51 = vector.load %arg6[%c0_18, %c0_19, %c0_20] : memref<1x32x256xf32, #tpu.memory_space<vmem>>, vector<1x32x256xf32>
    %52 = vector.shape_cast %51 : vector<1x32x256xf32> to vector<32x256xf32>
    %53 = vector.shape_cast %50 : vector<32x256xf32> to vector<1x32x256xf32>
    tpu.vector_store %arg6[%c0_18, %c0_19, %c0_20], %53 {strides = array<i32>} : memref<1x32x256xf32, #tpu.memory_space<vmem>>, vector<1x32x256xf32>,
    return
  }
  func.func @transform_0(%arg0: i32) -> (i32, i32, i32) {
    %c0_i32 = arith.constant 0 : i32
    %c0_i32_0 = arith.constant 0 : i32
    %c0_i32_1 = arith.constant 0 : i32
    return %arg0, %c0_i32, %c0_i32_0 : i32, i32, i32
  }
  func.func @transform_1(%arg0: i32) -> (i32, i32, i32) {
    %c0_i32 = arith.constant 0 : i32
    %c0_i32_0 = arith.constant 0 : i32
    %c0_i32_1 = arith.constant 0 : i32
    return %arg0, %c0_i32, %c0_i32_0 : i32, i32, i32
  }
  func.func @transform_2(%arg0: i32) -> (i32, i32) {
    %c0_i32 = arith.constant 0 : i32
    %c0_i32_0 = arith.constant 0 : i32
    %c0_i32_1 = arith.constant 0 : i32
    return %c0_i32, %c0_i32_0 : i32, i32
  }
  func.func @transform_3(%arg0: i32) -> (i32, i32) {
    %c0_i32 = arith.constant 0 : i32
    %c0_i32_0 = arith.constant 0 : i32
    %c0_i32_1 = arith.constant 0 : i32
    return %c0_i32, %c0_i32_0 : i32, i32
  }
  func.func @transform_4(%arg0: i32) -> (i32, i32, i32) {
    %c0_i32 = arith.constant 0 : i32
    %c0_i32_0 = arith.constant 0 : i32
    %c0_i32_1 = arith.constant 0 : i32
    return %arg0, %c0_i32, %c0_i32_0 : i32, i32, i32
  }
  func.func @transform_5(%arg0: i32) -> (i32, i32, i32) {
    %c0_i32 = arith.constant 0 : i32
    %c0_i32_0 = arith.constant 0 : i32
    %c0_i32_1 = arith.constant 0 : i32
    return %arg0, %c0_i32, %c0_i32_0 : i32, i32, i32
  }
}

</mosaic_0001>

<bundles_post_ra>
// kernel: tpu_custom_call.1
= control target key start
LH: loop header
LB: loop body
LE: loop exit
PB: predicated region body
PF: predicated region fallthrough
CT: control target
= control target key end

     0   :  { %11 = vsyncpa [#allocation3], 0  ;;  %s4166_s0 = inlined_call_operand.vmem [shape: f32[2,32,256], index: 0, kind: input, shape index: {}]   ;;  %s4167_s1 = inlined_call_operand.vmem [shape: f32[2,32,256], index: 1, kind: input, shape index: {}]   ;;  %s4168_s2 = inlined_call_operand.vmem [shape: f32[104,64], index: 2, kind: input, shape index: {}]   ;;  %s4169_s3 = inlined_call_operand.vmem [shape: f32[104,1], index: 3, kind: input, shape index: {}]   ;;  %s4170_s4 = inlined_call_operand.hbm [shape: f32[2,32,256], index: 4, kind: output, shape index: {0}]   ;;  %s4171_s5 = inlined_call_operand.hbm [shape: f32[2,32,256], index: 5, kind: output, shape index: {1}]  }
   0x1   :  { %13 = vsyncpa [#allocation3 + $0x1], 0 }
   0x2   :  { %14 = vsyncpa [#allocation5], 0 }
   0x3   :  { %16 = vsyncpa [#allocation5 + $0x1], 0  ;;  %s2591_s18 = smov 0   ;;  %s2593_s19 = smov 0  }
   0x4   :  { %s2595_s20 = smov 0   ;;  %s2597_s21 = smov 0  }
   0x5 LB: > { %s2612_s22 = sadd.s32 4294967295, %s2553_s21   ;;  %s2044_s23 = sadd.s32 4294967294, %s2553_s21   ;;  %s2553_s21 = sphi %s2597_s21, %s4599_s21   ;;  %s2549_s20 = sphi %s2595_s20, %s4598_s20   ;;  %s2545_s19 = sphi %s2593_s19, %s4597_s19   ;;  %s2541_s18 = sphi %s2591_s18, %s4596_s18  }
   0x6   : > { %s2616_s24 = sadd.s32 1, %s2553_s21   ;;  %s123_s25 = sadd.s32 1, %s2549_s20 }
   0x7   : > { %s120_s26 = ssub.s32 %s2553_s21, %s2616_s24  ;;  %p133_p0 = scmp.ne.s32.totalorder %s2549_s20, %s2545_s19 }
   0x8   : > { %p121_p1 = scmp.eq.s32.totalorder %s120_s26, 0  ;;  %p134_p2 = scmp.eq.s32.totalorder %s2612_s22, 1 }
   0x9   : > { %p139_p3 = scmp.ne.s32.totalorder %s2545_s19, %s2541_s18  ;;  %p140_p4 = scmp.eq.s32.totalorder %s2044_s23, 1 }
   0xa   : > { %s2627_s27 = scalar_select %p121_p1, %s2549_s20, %s123_s25  }
   0xb   : > { %p2629_p5 = por %p134_p2, %p133_p0  ;;  %p2633_p6 = por %p140_p4, %p139_p3 }
   0xc   : > { %p2047_p7 = scmp.ge.s32.totalorder %s2553_s21, 1  ;;  %p206_p8 = scmp.lt.s32.totalorder %s2553_s21, 3 }
   0xe   : > { %p207_p9 = pnand %p2047_p7, %p206_p8 }
  0x10   : > { %210 = sbr.rel (%p207_p9) target bundleno = 1565 (0x61d), region = 36 }
  0x17   : > { %p244_p10 = scmp.lt.s32.totalorder %s2612_s22, 1  ;;  %v2555_v0 = vmov 0.0   ;;  %v4172_v1 = vmov 0   ;;  %v290_v2 = vld [vmem:[%s4169_s3 + $0x30] sm:$0xff]  ;;  %v284_v3 = vld [vmem:[%s4169_s3] sm:$0xff]  ;;  %v285_v25 = vld [vmem:[%s4169_s3 + $0x8] sm:$0xff] }
  0x18   : > { %466 = vmatprep.mubr.f32.mxu1 %v2555_v0  ;;  %2177 = vset.pattern.permute.xlu0 %v4172_v1  ;;  %v296_v18 = vld [vmem:[%s4169_s3 + $0x60] sm:$0xff]  ;;  %v286_v30 = vld [vmem:[%s4169_s3 + $0x10] sm:$0xff]  ;;  %vm362_vm0 = vcmask 523264   ;;  %v287_v32 = vld [vmem:[%s4169_s3 + $0x18] sm:$0xff]  ;;  %vm630_vm1 = vcmask 1043456   ;;  %vm581_vm2 = vcmask 64512  }
  0x19   : > { %s245_s30 = scalar_select %p244_p10, %s2612_s22, 1  ;;  %329 = vperm.xlu0 %2177, %v290_v2   ;;  %v271_v31 = vld [vmem:[%s4168_s2] sm:$0xff]  ;;  %v272_v33 = vld [vmem:[%s4168_s2 + $0x8] sm:$0xff]  ;;  %v273_v35 = vld [vmem:[%s4168_s2 + $0x10] sm:$0xff] }
  0x1a   : > { %v288_v34 = vld [vmem:[%s4169_s3 + $0x20] sm:$0xff]  ;;  %v289_v36 = vld [vmem:[%s4169_s3 + $0x28] sm:$0xff]  ;;  %v274_v37 = vld [vmem:[%s4168_s2 + $0x18] sm:$0xff]  ;;  %s3501_s7 = sand.u32 1, %s2545_s19   ;;  %s2557_s23 = smov [#allocation2]  }
  0x1b   : > { %s2109_s6 = sshll.u32 %s245_s30, 6  ;;  %v275_v38 = vld [vmem:[%s4168_s2 + $0x20] sm:$0xff]  ;;  %v276_v39 = vld [vmem:[%s4168_s2 + $0x28] sm:$0xff]  ;;  %v277_v40 = vld [vmem:[%s4168_s2 + $0x30] sm:$0xff]  ;;  %s2048_s8 = sshll.u32 %s3501_s7, 6 }
  0x1c   : > { %s2649_s11 = scalar_lea.vmem %s4166_s0, %s2109_s6  ;;  %s2654_s14 = scalar_lea.vmem %s4167_s1, %s2109_s6  ;;  %v278_v41 = vld [vmem:[%s4168_s2 + $0x38] sm:$0xff]  ;;  %v279_v42 = vld [vmem:[%s4168_s2 + $0x40] sm:$0xff]  ;;  %v280_v43 = vld [vmem:[%s4168_s2 + $0x48] sm:$0xff] }
  0x1d   : > { %v256_v4 = vld [vmem:[%s2649_s11 + $0x8] sm:$0xff]  ;;  %v258_v5 = vld [vmem:[%s2649_s11 + $0x18] sm:$0xff]  ;;  %v255_v6 = vld [vmem:[%s2649_s11] sm:$0xff]  ;;  %299 = vperm.xlu0 %2177, %v284_v3   ;;  %s3526_s9 = scalar_lea.vmem [#allocation2], %s2048_s8  ;;  %s1904_s16 = scalar_lea.sflag [#allocation3], %s3501_s7 }
  0x1e   : > { %v2113_v7 = vpack.c.bf16 %v258_v5, %v256_v4  ;;  %v257_v8 = vld [vmem:[%s2649_s11 + $0x10] sm:$0xff]  ;;  %v260_v9 = vld [vmem:[%s2649_s11 + $0x28] sm:$0xff]  ;;  %v262_v10 = vld [vmem:[%s2649_s11 + $0x38] sm:$0xff]  ;;  %s1922_s15 = sshll.u32 %s3526_s9, 4  ;;  %s2463_s25 = sshll.u32 %s2557_s23, 4  ;;  %s4061_s15 = int_to_ptr.vmem [resolvable:$true] %s1922_s15  ;;  %s2464_s25 = int_to_ptr.vmem [resolvable:$false] %s2463_s25 }
  0x1f   : > { %v2115_v11 = vpack.c.bf16 %v257_v8, %v255_v6  ;;  %v2117_v12 = vpack.c.bf16 %v262_v10, %v260_v9  ;;  %v259_v13 = vld [vmem:[%s2649_s11 + $0x20] sm:$0xff]  ;;  %v261_v14 = vld [vmem:[%s2649_s11 + $0x30] sm:$0xff]  ;;  %v264_v15 = vld [vmem:[%s2654_s14 + $0x8] sm:$0xff]  ;;  %s2459_s17 = scalar_lea.vmem %s4061_s15, 1024  ;;  %s2465_s26 = scalar_lea.vmem %s2464_s25, 2048 }
  0x20   : > { %2114 = vmatprep.subr.bf16.mxu1 %v2113_v7  ;;  %v266_v16 = vld [vmem:[%s2654_s14 + $0x18] sm:$0xff]  ;;  %v2119_v17 = vpack.c.bf16 %v261_v14, %v259_v13  ;;  %v263_v20 = vld [vmem:[%s2654_s14] sm:$0xff]  ;;  %v265_v21 = vld [vmem:[%s2654_s14 + $0x10] sm:$0xff]  ;;  %p2460_p11 = scmp.ne.s32.totalorder %s4061_s15, %s2459_s17  ;;  %p2466_p0 = scmp.lt.s32.totalorder %s4061_s15, %s2464_s25 }
  0x21   : > { %2116 = vmatpush1.bf16.msra.mxu1 %v2115_v11  ;;  %v2121_v19 = vpack.c.bf16 %v266_v16, %v264_v15  ;;  %v268_v22 = vld [vmem:[%s2654_s14 + $0x28] sm:$0xff]  ;;  %v270_v23 = vld [vmem:[%s2654_s14 + $0x38] sm:$0xff]  ;;  %359 = vperm.xlu0 %2177, %v296_v18   ;;  %v2123_v24 = vpack.c.bf16 %v265_v21, %v263_v20  ;;  %v267_v27 = vld [vmem:[%s2654_s14 + $0x20] sm:$0xff]  ;;  %p2467_p1 = scmp.lt.s32.totalorder %s2465_s26, %s2459_s17 }
  0x22   : > { %2118 = vmatprep.subr.bf16.mxu1 %v2117_v12  ;;  %v2125_v26 = vpack.c.bf16 %v270_v23, %v268_v22  ;;  %v269_v28 = vld [vmem:[%s2654_s14 + $0x30] sm:$0xff]  ;;  %v282_v45 = vld [vmem:[%s4168_s2 + $0x58] sm:$0xff]  ;;  %v283_v46 = vld [vmem:[%s4168_s2 + $0x60] sm:$0xff]  ;;  %p2461_p12 = pnand %p2460_p11, %p2629_p5 }
  0x23   : > { %v2127_v29 = vpack.c.bf16 %v269_v28, %v267_v27  ;;  %v281_v44 = vld [vmem:[%s4168_s2 + $0x50] sm:$0xff]  ;;  %p2468_p2 = por %p2467_p1, %p2466_p0 }
  0x24   : > { %p2462_p13 = pneg %p2461_p12 }
  0x25   : > { %2120 = vmatpush1.bf16.msra.mxu1 %v2119_v17  ;;  %304 = vperm.xlu0 %2177, %v285_v25  }
  0x26   : > { %2122 = vmatprep.subr.bf16.mxu1 %v2121_v19  ;;  %p2469_p3 = pnand %p2468_p2, %p2462_p13 }
  0x29   : > { %2124 = vmatpush1.bf16.msra.mxu1 %v2123_v24  ;;  %309 = vperm.xlu0 %2177, %v286_v30  }
  0x2a   : > { %2126 = vmatprep.subr.bf16.mxu1 %v2125_v26 }
  0x2d   : > { %2128 = vmatpush1.bf16.msra.mxu1 %v2127_v29  ;;  %314 = vperm.xlu0 %2177, %v287_v32  }
  0x30   : > { %2054 = vmatmul.mubr.msk.f32.vlgmr.msra.gmra.mrb[0].mxu1 %vm362_vm0, %v271_v31 }
  0x31   : > { %472 = vmatprep.mubr.f32.mxu1 %v2555_v0  ;;  %319 = vperm.xlu0 %2177, %v288_v34  }
  0x34   : > { %2055 = vmatmul.mubr.msk.f32.gmra.mrb[2].mxu1 %vm362_vm0, %v272_v33 }
  0x35   : > { %478 = vmatprep.mubr.f32.mxu1 %v2555_v0  ;;  %324 = vperm.xlu0 %2177, %v289_v36  }
  0x38   : > { %2056 = vmatmul.mubr.msk.f32.gmra.mrb[4].mxu1 %vm362_vm0, %v273_v35 }
  0x39   : > { %484 = vmatprep.mubr.f32.mxu1 %v2555_v0 }
  0x3c   : > { %2057 = vmatmul.mubr.msk.f32.gmra.mrb[6].mxu1 %vm362_vm0, %v274_v37 }
  0x3d   : > { %490 = vmatprep.mubr.f32.mxu1 %v2555_v0 }
  0x40   : > { %2058 = vmatmul.mubr.msk.f32.gmra.mrb[8].mxu1 %vm362_vm0, %v275_v38 }
  0x41   : > { %496 = vmatprep.mubr.f32.mxu1 %v2555_v0 }
  0x44   : > { %2059 = vmatmul.mubr.msk.f32.gmra.mrb[10].mxu1 %vm362_vm0, %v276_v39 }
  0x45   : > { %502 = vmatprep.mubr.f32.mxu1 %v2555_v0 }
  0x48   : > { %2060 = vmatmul.mubr.msk.f32.gmra.mrb[12].mxu1 %vm362_vm0, %v277_v40 }
  0x49   : > { %508 = vmatprep.mubr.f32.mxu1 %v2555_v0 }
  0x4c   : > { %2061 = vmatmul.mubr.msk.f32.gmra.mrb[14].mxu1 %vm362_vm0, %v278_v41 }
  0x4d   : > { %514 = vmatprep.mubr.f32.mxu1 %v2555_v0 }
  0x50   : > { %2062 = vmatmul.mubr.msk.f32.gmra.mrb[16].mxu1 %vm362_vm0, %v279_v42  ;;  %v291_v42 = vld [vmem:[%s4169_s3 + $0x38] sm:$0xff] }
  0x51   : > { %520 = vmatprep.mubr.f32.mxu1 %v2555_v0 }
  0x54   : > { %2063 = vmatmul.mubr.msk.f32.gmra.mrb[18].mxu1 %vm362_vm0, %v280_v43  ;;  %v295_v43 = vld [vmem:[%s4169_s3 + $0x58] sm:$0xff] }
  0x55   : > { %526 = vmatprep.mubr.f32.mxu1 %v2555_v0 }
  0x58   : > { %2064 = vmatmul.mubr.msk.f32.gmra.mrb[20].mxu1 %vm362_vm0, %v281_v44  ;;  %v292_v44 = vld [vmem:[%s4169_s3 + $0x40] sm:$0xff] }
  0x59   : > { %532 = vmatprep.mubr.f32.mxu1 %v2555_v0 }
  0x5c   : > { %2065 = vmatmul.mubr.msk.f32.gmra.mrb[22].mxu1 %vm362_vm0, %v282_v45  ;;  %v293_v45 = vld [vmem:[%s4169_s3 + $0x48] sm:$0xff] }
  0x5d   : > { %538 = vmatprep.mubr.f32.mxu1 %v2555_v0 }
  0x60   : > { %2066 = vmatmul.mubr.msk.f32.gmra.mrb[24].mxu1 %vm362_vm0, %v283_v46  ;;  %v294_v46 = vld [vmem:[%s4169_s3 + $0x50] sm:$0xff] }
  0x61   : > { %669 = vmatprep.mubr.bf16.mxu1 %v4172_v1 }
  0x98   : > { %v330_v47 = vpop.permute.xlu0 %329 }
  0x9c   : > { %v300_v48 = vpop.permute.xlu0 %299 }
  0xa0   : > { %v360_v49 = vpop.permute.xlu0 %359 }
  0xa4   : > { %v305_v50 = vpop.permute.xlu0 %304 }
  0xa8   : > { %v310_v55 = vpop.permute.xlu0 %309 }
  0xac   : > { %v315_v62 = vpop.permute.xlu0 %314 }
  0xb0   : > { %v320_v9 = vpop.permute.xlu0 %319 }
 0x103   : > { %v468_v51 = vpop.f32.mrb[0].mxu1 }
 0x104   : > { %v469_v52 = vadd.f32 %v468_v51, %v300_v48  ;;  %v470_v53 = vpop.f32.mrb[1].mxu1 }
 0x105   : > { %v471_v54 = vadd.f32 %v470_v53, %v300_v48 }
 0x106   : > { %v545_v56 = vpack.c.bf16 %v469_v52, %v469_v52 }
 0x107   : > { %v2758_v57 = vpack.c.bf16 %v471_v54, %v471_v54  ;;  %v474_v58 = vpop.f32.mrb[2].mxu1 }
 0x108   : > { %v2761_v59 = vsel %vm630_vm1, %v545_v56, 0  ;;  %v476_v60 = vpop.f32.mrb[3].mxu1  ;;  %v2766_v63 = vadd.f32 %v474_v58, %v305_v50  ;;  %v2833_v56 = vpop.permute.xlu0 %324 }
 0x109   : > { %4289 = vst [vmem:[#allocation8_spill] sm:$0xff] %v2758_v57  ;;  %4290 = vst [vmem:[#allocation9_spill] sm:$0xff] %v2761_v59  ;;  %2067 = vmatprep.subr.msk.bf16.mxu1 %vm630_vm1, %v2758_v57  ;;  %v477_v3 = vadd.f32 %v476_v60, %v305_v50 }
 0x10a   : > { %638 = vmatpush1.bf16.msra.mxu1 %v2761_v59  ;;  %4291 = vst [vmem:[#allocation10_spill] sm:$0xff] %v2766_v63  ;;  %4301 = vst [vmem:[#allocation20_spill] sm:$0xff] %v2833_v56 }
 0x10b   : > { %v480_v61 = vpop.f32.mrb[4].mxu1 }
 0x10c   : > { %v2768_v0 = vadd.f32 %v480_v61, %v310_v55  ;;  %v482_v2 = vpop.f32.mrb[5].mxu1 }
 0x10d   : > { %v483_v4 = vadd.f32 %v482_v2, %v310_v55 }
 0x10e   : > { %4292 = vst [vmem:[#allocation11_spill] sm:$0xff] %v2768_v0 }
 0x10f   : > { %v486_v6 = vpop.f32.mrb[6].mxu1  ;;  %v1097_v7 = vpack.c.bf16 %v483_v4, %v477_v3 }
 0x110   : > { %v488_v8 = vpop.f32.mrb[7].mxu1  ;;  %v2772_v11 = vadd.f32 %v486_v6, %v315_v62 }
 0x111   : > { %1166 = vmatprep.mubr.bf16.mxu0 %v1097_v7  ;;  %v2776_v14 = vadd.f32 %v488_v8, %v315_v62 }
 0x112   : > { %4293 = vst [vmem:[#allocation12_spill] sm:$0xff] %v2772_v11 }
 0x113   : > { %v492_v10 = vpop.f32.mrb[8].mxu1  ;;  %4295 = vst [vmem:[#allocation14_spill] sm:$0xff] %v2776_v14 }
 0x114   : > { %v2774_v12 = vadd.f32 %v492_v10, %v320_v9  ;;  %v494_v13 = vpop.f32.mrb[9].mxu1 }
 0x115   : > { %v2778_v15 = vadd.f32 %v494_v13, %v320_v9 }
 0x116   : > { %4294 = vst [vmem:[#allocation13_spill] sm:$0xff] %v2774_v12 }
 0x117   : > { %4296 = vst [vmem:[#allocation15_spill] sm:$0xff] %v2778_v15  ;;  %v2784_v18 = vpop.f32.mrb[10].mxu1 }
 0x118   : > { %4297 = vst [vmem:[#allocation16_spill] sm:$0xff] %v2784_v18  ;;  %v2786_v19 = vpop.f32.mrb[11].mxu1 }
 0x119   : > { %4298 = vst [vmem:[#allocation17_spill] sm:$0xff] %v2786_v19 }
 0x11b   : > { %v504_v20 = vpop.f32.mrb[12].mxu1 }
 0x11c   : > { %v506_v21 = vpop.f32.mrb[13].mxu1  ;;  %v505_v22 = vadd.f32 %v504_v20, %v330_v47 }
 0x11d   : > { %v507_v38 = vadd.f32 %v506_v21, %v330_v47 }
 0x11e   : > { %v547_v23 = vpack.c.bf16 %v505_v22, %v505_v22 }
 0x11f   : > { %v2788_v24 = vpop.f32.mrb[14].mxu1  ;;  %v548_v39 = vpack.c.bf16 %v507_v38, %v507_v38 }
 0x120   : > { %549 = vxpose.xlu1.c.b16.start.end [1/1] (short) %v547_v23, 128  ;;  %v2790_v25 = vpop.f32.mrb[15].mxu1 }
 0x123   : > { %v2792_v26 = vpop.f32.mrb[16].mxu1 }
 0x124   : > { %v2794_v27 = vpop.f32.mrb[17].mxu1 }
 0x127   : > { %v2796_v28 = vpop.f32.mrb[18].mxu1 }
 0x128   : > { %v2798_v29 = vpop.f32.mrb[19].mxu1 }
 0x12b   : > { %v2800_v30 = vpop.f32.mrb[20].mxu1 }
 0x12c   : > { %v2802_v31 = vpop.f32.mrb[21].mxu1 }
 0x12f   : > { %v2804_v32 = vpop.f32.mrb[22].mxu1 }
 0x130   : > { %4299 = vst [vmem:[#allocation18_spill] sm:$0xff] %v2804_v32  ;;  %v2806_v33 = vpop.f32.mrb[23].mxu1 }
 0x131   : > { %4300 = vst [vmem:[#allocation19_spill] sm:$0xff] %v2806_v33 }
 0x133   : > { %v540_v34 = vpop.f32.mrb[24].mxu1 }
 0x134   : > { %v541_v35 = vadd.f32 %v540_v34, %v360_v49  ;;  %v542_v36 = vpop.f32.mrb[25].mxu1 }
 0x135   : > { %v543_v40 = vadd.f32 %v542_v36, %v360_v49 }
 0x136   : > { %v1229_v37 = vpack.c.bf16 %v541_v35, %v541_v35 }
 0x137   : > { %v1230_v41 = vpack.c.bf16 %v543_v40, %v543_v40 }
 0x138   : > { %1231 = vxpose.xlu0.c.b16.start.end [1/1] (short) %v1229_v37, 128 }
 0x13d   : > { %565 = vxpose.xlu1.c.b16.start.end [1/1] (short) %v548_v39, 128 }
 0x15a   : > { %1247 = vxpose.xlu1.c.b16.start.end [1/1] (short) %v1230_v41, 128 }
 0x15d   : > { %334 = vperm.xlu0 %2177, %v291_v42  }
 0x15e   : > { %2178 = vset.pattern.permute.xlu1 %v4172_v1 }
 0x161   : > { %354 = vperm.xlu0 %2177, %v295_v43  }
 0x17a   : > { %339 = vperm.xlu1 %2178, %v292_v44  }
 0x17e   : > { %344 = vperm.xlu1 %2178, %v293_v45  }
 0x182   : > { %349 = vperm.xlu1 %2178, %v294_v46  }
 0x186   : > { %v557_v47 = vpop.trf.xlu1 }
 0x187   : > { %2068 = vmatmul.mubr.msk.bf16.vlgmr.msra.gmra.mrb[28].mxu1 %vm581_vm2, %v557_v47 }
 0x188   : > { %679 = vmatprep.mubr.bf16.mxu1 %v4172_v1 }
 0x18a   : > { %v558_v48 = vpop.trf.xlu1 }
 0x18e   : > { %v559_v49 = vpop.trf.xlu1 }
 0x18f   : > { %2069 = vmatmul.mubr.msk.bf16.gmra.mrb[32].mxu1 %vm581_vm2, %v558_v48 }
 0x190   : > { %689 = vmatprep.mubr.bf16.mxu1 %v4172_v1 }
 0x192   : > { %v560_v50 = vpop.trf.xlu1 }
 0x196   : > { %v561_v51 = vpop.trf.xlu1 }
 0x197   : > { %2070 = vmatmul.mubr.msk.bf16.gmra.mrb[36].mxu1 %vm581_vm2, %v559_v49 }
 0x198   : > { %699 = vmatprep.mubr.bf16.mxu1 %v4172_v1 }
 0x19a   : > { %v562_v52 = vpop.trf.xlu1 }
 0x19e   : > { %v563_v53 = vpop.trf.xlu1  ;;  %v2836_v60 = vpop.trf.xlu0 }
 0x19f   : > { %2071 = vmatmul.mubr.msk.bf16.gmra.mrb[40].mxu1 %vm581_vm2, %v560_v50  ;;  %4302 = vst [vmem:[#allocation21_spill] sm:$0xff] %v2836_v60 }
 0x1a0   : > { %709 = vmatprep.mubr.bf16.mxu1 %v4172_v1 }
 0x1a2   : > { %v564_v54 = vpop.trf.xlu1  ;;  %v2840_v62 = vpop.trf.xlu0 }
 0x1a3   : > { %4303 = vst [vmem:[#allocation22_spill] sm:$0xff] %v2840_v62 }
 0x1a6   : > { %v573_v55 = vpop.trf.xlu1  ;;  %v2844_v4 = vpop.trf.xlu0 }
 0x1a7   : > { %2072 = vmatmul.mubr.msk.bf16.gmra.mrb[44].mxu1 %vm581_vm2, %v561_v51  ;;  %4304 = vst [vmem:[#allocation23_spill] sm:$0xff] %v2844_v4 }
 0x1a8   : > { %719 = vmatprep.mubr.bf16.mxu1 %v4172_v1 }
 0x1aa   : > { %v574_v58 = vpop.trf.xlu1  ;;  %v2846_v7 = vpop.trf.xlu0 }
 0x1ab   : > { %4305 = vst [vmem:[#allocation24_spill] sm:$0xff] %v2846_v7 }
 0x1ae   : > { %v575_v61 = vpop.trf.xlu1  ;;  %v2850_v10 = vpop.trf.xlu0 }
 0x1af   : > { %2073 = vmatmul.mubr.msk.bf16.gmra.mrb[48].mxu1 %vm581_vm2, %v562_v52  ;;  %4306 = vst [vmem:[#allocation25_spill] sm:$0xff] %v2850_v10 }
 0x1b0   : > { %729 = vmatprep.mubr.bf16.mxu1 %v4172_v1 }
 0x1b2   : > { %v576_v2 = vpop.trf.xlu1  ;;  %v2856_v20 = vpop.trf.xlu0 }
 0x1b3   : > { %4308 = vst [vmem:[#allocation27_spill] sm:$0xff] %v2856_v20 }
 0x1b6   : > { %v577_v3 = vpop.trf.xlu1  ;;  %v2861_v22 = vpop.trf.xlu0 }
 0x1b7   : > { %2074 = vmatmul.mubr.msk.bf16.gmra.mrb[52].mxu1 %vm581_vm2, %v563_v53  ;;  %4310 = vst [vmem:[#allocation29_spill] sm:$0xff] %v2861_v22 }
 0x1b8   : > { %739 = vmatprep.mubr.bf16.mxu1 %v4172_v1 }
 0x1ba   : > { %v578_v6 = vpop.trf.xlu1  ;;  %v2866_v34 = vpop.trf.xlu0 }
 0x1bb   : > { %4312 = vst [vmem:[#allocation31_spill] sm:$0xff] %v2866_v34 }
 0x1be   : > { %v579_v8 = vpop.trf.xlu1 }
 0x1bf   : > { %2075 = vmatmul.mubr.msk.bf16.gmra.mrb[56].mxu1 %vm581_vm2, %v564_v54 }
 0x1c0   : > { %749 = vmatprep.mubr.bf16.mxu1 %v4172_v1 }
 0x1c2   : > { %v580_v9 = vpop.trf.xlu1 }
 0x1c6   : > { %v2854_v13 = vpop.trf.xlu1 }
 0x1c7   : > { %2076 = vmatmul.mubr.msk.bf16.gmra.mrb[60].mxu1 %vm581_vm2, %v573_v55  ;;  %4307 = vst [vmem:[#allocation26_spill] sm:$0xff] %v2854_v13 }
 0x1c8   : > { %759 = vmatprep.mubr.bf16.mxu1 %v4172_v1 }
 0x1ca   : > { %v2859_v21 = vpop.trf.xlu1 }
 0x1cb   : > { %4309 = vst [vmem:[#allocation28_spill] sm:$0xff] %v2859_v21 }
 0x1ce   : > { %v2864_v23 = vpop.trf.xlu1 }
 0x1cf   : > { %2077 = vmatmul.mubr.msk.bf16.gmra.mrb[64].mxu1 %vm581_vm2, %v574_v58  ;;  %4311 = vst [vmem:[#allocation30_spill] sm:$0xff] %v2864_v23 }
 0x1d0   : > { %769 = vmatprep.mubr.bf16.mxu1 %v4172_v1 }
 0x1d2   : > { %v2870_v35 = vpop.trf.xlu1 }
 0x1d3   : > { %4313 = vst [vmem:[#allocation32_spill] sm:$0xff] %v2870_v35 }
 0x1d6   : > { %v2877_v38 = vpop.trf.xlu1 }
 0x1d7   : > { %2078 = vmatmul.mubr.msk.bf16.gmra.mrb[68].mxu1 %vm581_vm2, %v575_v61  ;;  %4315 = vst [vmem:[#allocation34_spill] sm:$0xff] %v2877_v38 }
 0x1d8   : > { %779 = vmatprep.mubr.bf16.mxu1 %v4172_v1 }
 0x1da   : > { %v2880_v39 = vpop.trf.xlu1 }
 0x1db   : > { %4316 = vst [vmem:[#allocation35_spill] sm:$0xff] %v2880_v39 }
 0x1dc   : > { %v335_v36 = vpop.permute.xlu0 %334 }
 0x1dd   : > { %v2873_v37 = vadd.f32 %v2788_v24, %v335_v36  ;;  %v513_v42 = vadd.f32 %v2790_v25, %v335_v36 }
 0x1de   : > { %v2883_v40 = vpop.trf.xlu1 }
 0x1df   : > { %4314 = vst [vmem:[#allocation33_spill] sm:$0xff] %v2873_v37  ;;  %2079 = vmatmul.mubr.msk.bf16.gmra.mrb[72].mxu1 %vm581_vm2, %v576_v2  ;;  %4317 = vst [vmem:[#allocation36_spill] sm:$0xff] %v2883_v40 }
 0x1e0   : > { %789 = vmatprep.mubr.bf16.mxu1 %v4172_v1 }
 0x1e2   : > { %v2887_v24 = vpop.trf.xlu1 }
 0x1e3   : > { %4318 = vst [vmem:[#allocation37_spill] sm:$0xff] %v2887_v24 }
 0x1e7   : > { %2080 = vmatmul.mubr.msk.bf16.gmra.mrb[76].mxu1 %vm581_vm2, %v577_v3 }
 0x1e8   : > { %799 = vmatprep.mubr.bf16.mxu1 %v4172_v1 }
 0x1ef   : > { %2081 = vmatmul.mubr.msk.bf16.gmra.mrb[80].mxu1 %vm581_vm2, %v578_v6 }
 0x1f0   : > { %809 = vmatprep.mubr.bf16.mxu1 %v4172_v1 }
 0x1f7   : > { %2082 = vmatmul.mubr.msk.bf16.gmra.mrb[84].mxu1 %vm581_vm2, %v579_v8 }
 0x1f8   : > { %819 = vmatprep.mubr.bf16.mxu1 %v4172_v1 }
 0x1f9   : > { %v340_v41 = vpop.permute.xlu1 %339 }
 0x1fa   : > { %v2893_v43 = vadd.f32 %v2792_v26, %v340_v41  ;;  %v519_v44 = vadd.f32 %v2794_v27, %v340_v41 }
 0x1fc   : > { %4319 = vst [vmem:[#allocation38_spill] sm:$0xff] %v2893_v43  ;;  %v1771_v46 = vpack.c.bf16 %v519_v44, %v513_v42 }
 0x1fd   : > { %v345_v47 = vpop.permute.xlu1 %344 }
 0x1fe   : > { %v2900_v48 = vadd.f32 %v2796_v28, %v345_v47  ;;  %v2903_v49 = vadd.f32 %v2798_v29, %v345_v47 }
 0x1ff   : > { %2083 = vmatmul.mubr.msk.bf16.gmra.mrb[88].mxu1 %vm581_vm2, %v580_v9 }
 0x200   : > { %1840 = vmatprep.mubr.bf16.mxu1 %v1771_v46  ;;  %4320 = vst [vmem:[#allocation39_spill] sm:$0xff] %v2900_v48  ;;  %4321 = vst [vmem:[#allocation40_spill] sm:$0xff] %v2903_v49 }
 0x201   : > { %v350_v25 = vpop.permute.xlu1 %349 }
 0x202   : > { %v2906_v26 = vadd.f32 %v2800_v30, %v350_v25  ;;  %v2909_v27 = vadd.f32 %v2802_v31, %v350_v25 }
 0x204   : > { %4322 = vst [vmem:[#allocation41_spill] sm:$0xff] %v2906_v26  ;;  %4323 = vst [vmem:[#allocation42_spill] sm:$0xff] %v2909_v27 }
 0x25a   : > { %v2915_v52 = vpop.f32.mrb[28].mxu1 }
 0x25b   : > { %v2917_v28 = vpop.f32.mrb[29].mxu1 }
 0x25c   : > { %v2919_v53 = vpop.f32.mrb[30].mxu1 }
 0x25d   : > { %v2921_v29 = vpop.f32.mrb[31].mxu1 }
 0x262   : > { %v2923_v54 = vpop.f32.mrb[32].mxu1 }
 0x263   : > { %v830_v30 = vmax.f32 %v2915_v52, %v2923_v54  ;;  %v2927_v31 = vpop.f32.mrb[33].mxu1 }
 0x264   : > { %v867_v55 = vmax.f32 %v2917_v28, %v2927_v31  ;;  %v2931_v58 = vpop.f32.mrb[34].mxu1 }
 0x265   : > { %v831_v61 = vmax.f32 %v2919_v53, %v2931_v58  ;;  %v2935_v2 = vpop.f32.mrb[35].mxu1 }
 0x266   : > { %v868_v3 = vmax.f32 %v2921_v29, %v2935_v2 }
 0x26a   : > { %v2939_v6 = vpop.f32.mrb[36].mxu1 }
 0x26b   : > { %v832_v8 = vmax.f32 %v830_v30, %v2939_v6  ;;  %v2942_v9 = vpop.f32.mrb[37].mxu1 }
 0x26c   : > { %v869_v36 = vmax.f32 %v867_v55, %v2942_v9  ;;  %v2945_v41 = vpop.f32.mrb[38].mxu1 }
 0x26d   : > { %v833_v42 = vmax.f32 %v831_v61, %v2945_v41  ;;  %v2948_v44 = vpop.f32.mrb[39].mxu1 }
 0x26e   : > { %v870_v46 = vmax.f32 %v868_v3, %v2948_v44 }
 0x272   : > { %v2951_v47 = vpop.f32.mrb[40].mxu1 }
 0x273   : > { %v834_v25 = vmax.f32 %v832_v8, %v2951_v47  ;;  %v2954_v50 = vpop.f32.mrb[41].mxu1 }
 0x274   : > { %v871_v30 = vmax.f32 %v869_v36, %v2954_v50  ;;  %v2957_v51 = vpop.f32.mrb[42].mxu1 }
 0x275   : > { %v835_v55 = vmax.f32 %v833_v42, %v2957_v51  ;;  %v2960_v45 = vpop.f32.mrb[43].mxu1 }
 0x276   : > { %v872_v61 = vmax.f32 %v870_v46, %v2960_v45 }
 0x27a   : > { %v2963_v1 = vpop.f32.mrb[44].mxu1 }
 0x27b   : > { %v836_v3 = vmax.f32 %v834_v25, %v2963_v1  ;;  %v2966_v16 = vpop.f32.mrb[45].mxu1 }
 0x27c   : > { %v873_v8 = vmax.f32 %v871_v30, %v2966_v16  ;;  %v2969_v17 = vpop.f32.mrb[46].mxu1 }
 0x27d   : > { %v837_v36 = vmax.f32 %v835_v55, %v2969_v17  ;;  %v2972_v5 = vpop.f32.mrb[47].mxu1 }
 0x27e   : > { %v874_v42 = vmax.f32 %v872_v61, %v2972_v5 }
 0x282   : > { %v2975_v32 = vpop.f32.mrb[48].mxu1 }
 0x283   : > { %v838_v46 = vmax.f32 %v836_v3, %v2975_v32  ;;  %v2978_v48 = vpop.f32.mrb[49].mxu1 }
 0x284   : > { %4324 = vst [vmem:[#allocation43_spill] sm:$0xff] %v2978_v48  ;;  %v875_v25 = vmax.f32 %v873_v8, %v2978_v48  ;;  %v2981_v26 = vpop.f32.mrb[50].mxu1 }
 0x285   : > { %v839_v30 = vmax.f32 %v837_v36, %v2981_v26  ;;  %v2984_v33 = vpop.f32.mrb[51].mxu1 }
 0x286   : > { %4325 = vst [vmem:[#allocation44_spill] sm:$0xff] %v2984_v33  ;;  %v876_v55 = vmax.f32 %v874_v42, %v2984_v33 }
 0x28a   : > { %v2987_v49 = vpop.f32.mrb[52].mxu1 }
 0x28b   : > { %v840_v61 = vmax.f32 %v838_v46, %v2987_v49  ;;  %v2990_v27 = vpop.f32.mrb[53].mxu1 }
 0x28c   : > { %4326 = vst [vmem:[#allocation45_spill] sm:$0xff] %v2990_v27  ;;  %v877_v3 = vmax.f32 %v875_v25, %v2990_v27  ;;  %v2993_v37 = vpop.f32.mrb[54].mxu1 }
 0x28d   : > { %v841_v8 = vmax.f32 %v839_v30, %v2993_v37  ;;  %v2996_v43 = vpop.f32.mrb[55].mxu1 }
 0x28e   : > { %4327 = vst [vmem:[#allocation46_spill] sm:$0xff] %v2996_v43  ;;  %v878_v36 = vmax.f32 %v876_v55, %v2996_v43 }
 0x292   : > { %v2999_v24 = vpop.f32.mrb[56].mxu1 }
 0x293   : > { %v842_v42 = vmax.f32 %v840_v61, %v2999_v24  ;;  %v3002_v40 = vpop.f32.mrb[57].mxu1 }
 0x294   : > { %4328 = vst [vmem:[#allocation47_spill] sm:$0xff] %v3002_v40  ;;  %v879_v46 = vmax.f32 %v877_v3, %v3002_v40  ;;  %v3005_v39 = vpop.f32.mrb[58].mxu1 }
 0x295   : > { %v843_v25 = vmax.f32 %v841_v8, %v3005_v39  ;;  %v3008_v38 = vpop.f32.mrb[59].mxu1 }
 0x296   : > { %4329 = vst [vmem:[#allocation48_spill] sm:$0xff] %v3008_v38  ;;  %v880_v30 = vmax.f32 %v878_v36, %v3008_v38 }
 0x29a   : > { %v3011_v35 = vpop.f32.mrb[60].mxu1 }
 0x29b   : > { %v844_v55 = vmax.f32 %v842_v42, %v3011_v35  ;;  %v3014_v23 = vpop.f32.mrb[61].mxu1 }
 0x29c   : > { %4330 = vst [vmem:[#allocation49_spill] sm:$0xff] %v3014_v23  ;;  %v881_v61 = vmax.f32 %v879_v46, %v3014_v23  ;;  %v3017_v21 = vpop.f32.mrb[62].mxu1 }
 0x29d   : > { %v845_v3 = vmax.f32 %v843_v25, %v3017_v21  ;;  %v3020_v13 = vpop.f32.mrb[63].mxu1 }
 0x29e   : > { %4331 = vst [vmem:[#allocation50_spill] sm:$0xff] %v3020_v13  ;;  %v882_v8 = vmax.f32 %v880_v30, %v3020_v13 }
 0x2a2   : > { %v3023_v34 = vpop.f32.mrb[64].mxu1 }
 0x2a3   : > { %v846_v36 = vmax.f32 %v844_v55, %v3023_v34  ;;  %v3026_v22 = vpop.f32.mrb[65].mxu1 }
 0x2a4   : > { %4332 = vst [vmem:[#allocation51_spill] sm:$0xff] %v3026_v22  ;;  %v883_v42 = vmax.f32 %v881_v61, %v3026_v22  ;;  %v3029_v20 = vpop.f32.mrb[66].mxu1 }
 0x2a5   : > { %v847_v46 = vmax.f32 %v845_v3, %v3029_v20  ;;  %v3032_v10 = vpop.f32.mrb[67].mxu1 }
 0x2a6   : > { %4333 = vst [vmem:[#allocation52_spill] sm:$0xff] %v3032_v10  ;;  %v884_v25 = vmax.f32 %v882_v8, %v3032_v10 }
 0x2aa   : > { %v3035_v7 = vpop.f32.mrb[68].mxu1 }
 0x2ab   : > { %v848_v30 = vmax.f32 %v846_v36, %v3035_v7  ;;  %v3038_v4 = vpop.f32.mrb[69].mxu1 }
 0x2ac   : > { %4334 = vst [vmem:[#allocation53_spill] sm:$0xff] %v3038_v4  ;;  %v885_v55 = vmax.f32 %v883_v42, %v3038_v4  ;;  %v3041_v62 = vpop.f32.mrb[70].mxu1 }
 0x2ad   : > { %v849_v61 = vmax.f32 %v847_v46, %v3041_v62  ;;  %v3044_v60 = vpop.f32.mrb[71].mxu1 }
 0x2ae   : > { %4335 = vst [vmem:[#allocation54_spill] sm:$0xff] %v3044_v60  ;;  %v886_v3 = vmax.f32 %v884_v25, %v3044_v60 }
 0x2b2   : > { %v3047_v18 = vpop.f32.mrb[72].mxu1 }
 0x2b3   : > { %v850_v8 = vmax.f32 %v848_v30, %v3047_v18  ;;  %v3050_v11 = vpop.f32.mrb[73].mxu1 }
 0x2b4   : > { %4336 = vst [vmem:[#allocation55_spill] sm:$0xff] %v3050_v11  ;;  %v887_v36 = vmax.f32 %v885_v55, %v3050_v11  ;;  %v3053_v12 = vpop.f32.mrb[74].mxu1 }
 0x2b5   : > { %4337 = vst [vmem:[#allocation56_spill] sm:$0xff] %v3053_v12  ;;  %v851_v42 = vmax.f32 %v849_v61, %v3053_v12  ;;  %v3056_v19 = vpop.f32.mrb[75].mxu1 }
 0x2b6   : > { %4338 = vst [vmem:[#allocation57_spill] sm:$0xff] %v3056_v19  ;;  %v888_v46 = vmax.f32 %v886_v3, %v3056_v19 }
 0x2ba   : > { %v3059_v56 = vpop.f32.mrb[76].mxu1 }
 0x2bb   : > { %4339 = vst [vmem:[#allocation58_spill] sm:$0xff] %v3059_v56  ;;  %v852_v25 = vmax.f32 %v850_v8, %v3059_v56  ;;  %v3062_v59 = vpop.f32.mrb[77].mxu1 }
 0x2bc   : > { %4340 = vst [vmem:[#allocation59_spill] sm:$0xff] %v3062_v59  ;;  %v889_v30 = vmax.f32 %v887_v36, %v3062_v59  ;;  %v3065_v14 = vpop.f32.mrb[78].mxu1 }
 0x2bd   : > { %4341 = vst [vmem:[#allocation60_spill] sm:$0xff] %v3065_v14  ;;  %v853_v55 = vmax.f32 %v851_v42, %v3065_v14  ;;  %v3068_v15 = vpop.f32.mrb[79].mxu1 }
 0x2be   : > { %4342 = vst [vmem:[#allocation61_spill] sm:$0xff] %v3068_v15  ;;  %v890_v61 = vmax.f32 %v888_v46, %v3068_v15 }
 0x2c2   : > { %v3071_v63 = vpop.f32.mrb[80].mxu1 }
 0x2c3   : > { %4343 = vst [vmem:[#allocation62_spill] sm:$0xff] %v3071_v63  ;;  %v854_v3 = vmax.f32 %v852_v25, %v3071_v63  ;;  %v3074_v0 = vpop.f32.mrb[81].mxu1 }
 0x2c4   : > { %4344 = vst [vmem:[#allocation63_spill] sm:$0xff] %v3074_v0  ;;  %v891_v8 = vmax.f32 %v889_v30, %v3074_v0  ;;  %v3077_v57 = vpop.f32.mrb[82].mxu1 }
 0x2c5   : > { %4345 = vst [vmem:[#allocation64_spill] sm:$0xff] %v3077_v57  ;;  %v855_v36 = vmax.f32 %v853_v55, %v3077_v57  ;;  %v3080_v59 = vpop.f32.mrb[83].mxu1 }
 0x2c6   : > { %4346 = vst [vmem:[#allocation65_spill] sm:$0xff] %v3080_v59  ;;  %v892_v42 = vmax.f32 %v890_v61, %v3080_v59 }
 0x2ca   : > { %v3083_v19 = vpop.f32.mrb[84].mxu1 }
 0x2cb   : > { %4347 = vst [vmem:[#allocation66_spill] sm:$0xff] %v3083_v19  ;;  %v856_v46 = vmax.f32 %v854_v3, %v3083_v19  ;;  %v3086_v15 = vpop.f32.mrb[85].mxu1 }
 0x2cc   : > { %4348 = vst [vmem:[#allocation67_spill] sm:$0xff] %v3086_v15  ;;  %v893_v25 = vmax.f32 %v891_v8, %v3086_v15  ;;  %v3089_v11 = vpop.f32.mrb[86].mxu1 }
 0x2cd   : > { %4349 = vst [vmem:[#allocation68_spill] sm:$0xff] %v3089_v11  ;;  %v857_v30 = vmax.f32 %v855_v36, %v3089_v11  ;;  %v3092_v0 = vpop.f32.mrb[87].mxu1 }
 0x2ce   : > { %4350 = vst [vmem:[#allocation69_spill] sm:$0xff] %v3092_v0  ;;  %v894_v55 = vmax.f32 %v892_v42, %v3092_v0 }
 0x2d2   : > { %v3095_v60 = vpop.f32.mrb[88].mxu1 }
 0x2d3   : > { %4351 = vst [vmem:[#allocation70_spill] sm:$0xff] %v3095_v60  ;;  %v858_v61 = vmax.f32 %v856_v46, %v3095_v60  ;;  %v3098_v59 = vpop.f32.mrb[89].mxu1  ;;  %v4370_v60 = vld [vmem:[#allocation67_spill] sm:$0xff] }
 0x2d4   : > { %v895_v3 = vmax.f32 %v893_v25, %v3098_v59  ;;  %v825_v4 = vpop.f32.mrb[90].mxu1 }
 0x2d5   : > { %v859_v10 = vmax.f32 %v857_v30, %v825_v4  ;;  %v827_v22 = vpop.f32.mrb[91].mxu1  ;;  %v4371_v11 = vld [vmem:[#allocation69_spill] sm:$0xff] }
 0x2d6   : > { %v896_v8 = vmax.f32 %v894_v55, %v827_v22 }
 0x2d7   : > { %v860_v15 = vmax.f32 %v858_v61, %v859_v10 }
 0x2d8   : > { %v897_v13 = vmax.f32 %v895_v3, %v896_v8 }
 0x2d9   : > { %v861_v23 = vrot.slane %v860_v15, 4 }
 0x2da   : > { %v898_v36 = vrot.slane %v897_v13, 4 }
 0x2db   : > { %v862_v38 = vmax.f32 %v860_v15, %v861_v23  ;;  %v4366_v15 = vld [vmem:[#allocation59_spill] sm:$0xff] }
 0x2dc   : > { %v899_v40 = vmax.f32 %v897_v13, %v898_v36  ;;  %v4365_v13 = vld [vmem:[#allocation57_spill] sm:$0xff] }
 0x2dd   : > { %v863_v43 = vrot.slane %v862_v38, 2 }
 0x2de   : > { %v900_v42 = vrot.slane %v899_v40, 2 }
 0x2df   : > { %v864_v0 = vmax.f32 %v862_v38, %v863_v43  ;;  %v4359_v43 = vld [vmem:[#allocation50_spill] sm:$0xff] }
 0x2e0   : > { %v901_v27 = vmax.f32 %v899_v40, %v900_v42 }
 0x2e1   : > { %v865_v33 = vrot.slane %v864_v0, 1 }
 0x2e2   : > { %v902_v48 = vrot.slane %v901_v27, 1 }
 0x2e3   : > { %v3101_v46 = vmax.f32 %v864_v0, %v865_v33  ;;  %v4362_v33 = vld [vmem:[#allocation53_spill] sm:$0xff]  ;;  %v4363_v0 = vld [vmem:[#allocation54_spill] sm:$0xff] }
 0x2e4   : > { %v3138_v40 = vmax.f32 %v901_v27, %v902_v48 }
 0x2e5   : > { %v966_v25 = vsub.f32 %v825_v4, %v3101_v46  ;;  %v4361_v4 = vld [vmem:[#allocation52_spill] sm:$0xff]  ;;  %v4372_v57 = vsub.f32 %v2915_v52, %v3101_v46  ;;  %v4373_v14 = vsub.f32 %v2919_v53, %v3101_v46  ;;  %v4374_v56 = vsub.f32 %v2923_v54, %v3101_v46 }
 0x2e6   : > { %v967_v27 = vsub.f32 %v827_v22, %v3138_v40  ;;  %v905_v61 = vsub.f32 %v2917_v28, %v3138_v40  ;;  %v907_v3 = vsub.f32 %v2921_v29, %v3138_v40  ;;  %v909_v8 = vsub.f32 %v2927_v31, %v3138_v40  ;;  %v4356_v28 = vld [vmem:[#allocation47_spill] sm:$0xff]  ;;  %v4357_v29 = vld [vmem:[#allocation48_spill] sm:$0xff]  ;;  %v4358_v31 = vld [vmem:[#allocation49_spill] sm:$0xff] }
 0x2e7   : > { %v911_v36 = vsub.f32 %v2935_v2, %v3138_v40  ;;  %v913_v42 = vsub.f32 %v2942_v9, %v3138_v40  ;;  %v1092_v55 = vmul.f32 1.442695, %v966_v25  ;;  %v915_v48 = vsub.f32 %v2948_v44, %v3138_v40  ;;  %v4352_v2 = vld [vmem:[#allocation43_spill] sm:$0xff]  ;;  %v4353_v9 = vld [vmem:[#allocation44_spill] sm:$0xff]  ;;  %v4354_v44 = vld [vmem:[#allocation45_spill] sm:$0xff] }
 0x2e8   : > { %v917_v22 = vsub.f32 %v2954_v50, %v3138_v40  ;;  %v1094_v38 = vmul.f32 1.442695, %v967_v27  ;;  %v4355_v50 = vld [vmem:[#allocation46_spill] sm:$0xff]  ;;  %v4360_v27 = vld [vmem:[#allocation51_spill] sm:$0xff]  ;;  %v4367_v25 = vld [vmem:[#allocation61_spill] sm:$0xff]  ;;  %v4375_v23 = vsub.f32 %v2931_v58, %v3101_v46  ;;  %v4380_v58 = vsub.f32 %v2963_v1, %v3101_v46 }
 0x2e9   : > { %2179 = vpow2.f32 %v1092_v55  ;;  %v968_v63 = vmul.f32 1.442695, %v4372_v57  ;;  %v972_v10 = vmul.f32 1.442695, %v4373_v14  ;;  %v976_v30 = vmul.f32 1.442695, %v4374_v56 }
 0x2ea   : > { %2181 = vpow2.f32 %v1094_v38  ;;  %v980_v12 = vmul.f32 1.442695, %v4375_v23  ;;  %v4376_v55 = vsub.f32 %v2939_v6, %v3101_v46  ;;  %v4377_v57 = vsub.f32 %v2945_v41, %v3101_v46 }
 0x2eb   : > { %2183 = vpow2.f32 %v968_v63  ;;  %v4378_v14 = vsub.f32 %v2951_v47, %v3101_v46  ;;  %v4379_v56 = vsub.f32 %v2957_v51, %v3101_v46  ;;  %v1000_v6 = vmul.f32 1.442695, %v4380_v58 }
 0x2ec   : > { %v984_v19 = vmul.f32 1.442695, %v4376_v55  ;;  %v988_v52 = vmul.f32 1.442695, %v4377_v57  ;;  %2185 = vpow2.f32 %v972_v10  ;;  %v4381_v63 = vsub.f32 %v2969_v17, %v3101_v46 }
 0x2ed   : > { %v992_v53 = vmul.f32 1.442695, %v4378_v14  ;;  %2187 = vpow2.f32 %v976_v30  ;;  %v996_v54 = vmul.f32 1.442695, %v4379_v56  ;;  %v970_v30 = vmul.f32 1.442695, %v905_v61 }
 0x2ee   : > { %2189 = vpow2.f32 %v980_v12  ;;  %v1004_v41 = vmul.f32 1.442695, %v4381_v63  ;;  %v974_v10 = vmul.f32 1.442695, %v907_v3  ;;  %v978_v12 = vmul.f32 1.442695, %v909_v8 }
 0x2ef   : > { %2191 = vpow2.f32 %v984_v19  ;;  %v982_v23 = vmul.f32 1.442695, %v911_v36  ;;  %v986_v19 = vmul.f32 1.442695, %v913_v42  ;;  %v990_v17 = vmul.f32 1.442695, %v915_v48 }
 0x2f0   : > { %2193 = vpow2.f32 %v988_v52  ;;  %v994_v57 = vmul.f32 1.442695, %v917_v22  ;;  %v4382_v61 = vsub.f32 %v2960_v45, %v3138_v40  ;;  %v4383_v36 = vsub.f32 %v2966_v16, %v3138_v40 }
 0x2f1   : > { %2195 = vpow2.f32 %v992_v53  ;;  %v4384_v48 = vsub.f32 %v2972_v5, %v3138_v40  ;;  %v4385_v45 = vsub.f32 %v2975_v32, %v3101_v46  ;;  %v4386_v16 = vsub.f32 %v4352_v2, %v3138_v40 }
 0x2f2   : > { %2197 = vpow2.f32 %v996_v54  ;;  %v998_v3 = vmul.f32 1.442695, %v4382_v61  ;;  %v1002_v42 = vmul.f32 1.442695, %v4383_v36  ;;  %v4387_v5 = vsub.f32 %v2981_v26, %v3101_v46 }
 0x2f3   : > { %v3261_v47 = vpop.eup %2179  ;;  %2199 = vpow2.f32 %v1000_v6  ;;  %v1006_v22 = vmul.f32 1.442695, %v4384_v48  ;;  %v1008_v56 = vmul.f32 1.442695, %v4385_v45  ;;  %v1010_v58 = vmul.f32 1.442695, %v4386_v16 }
 0x2f4   : > { %v3263_v51 = vpop.eup %2181  ;;  %2201 = vpow2.f32 %v1004_v41  ;;  %v1012_v63 = vmul.f32 1.442695, %v4387_v5  ;;  %v4388_v41 = vsub.f32 %v4353_v9, %v3138_v40  ;;  %v4396_v5 = vsub.f32 %v4357_v29, %v3138_v40 }
 0x2f5   : > { %v2184_v1 = vpop.eup %2183  ;;  %2203 = vpow2.f32 %v970_v30 }
 0x2f6   : > { %v2186_v38 = vpop.eup %2185  ;;  %2205 = vpow2.f32 %v974_v10  ;;  %v1014_v32 = vmul.f32 1.442695, %v4388_v41 }
 0x2f7   : > { %v3265_v55 = vpop.eup %2187  ;;  %2207 = vpow2.f32 %v978_v12  ;;  %v1102_v30 = vpack.c.bf16 %v2186_v38, %v2184_v1  ;;  %v4390_v38 = vsub.f32 %v4354_v44, %v3138_v40 }
 0x2f8   : > { %v3267_v52 = vpop.eup %2189  ;;  %2209 = vpow2.f32 %v982_v23 }
 0x2f9   : > { %v3272_v8 = vpop.eup %2191  ;;  %2211 = vpow2.f32 %v986_v19  ;;  %v1104_v12 = vpack.c.bf16 %v3267_v52, %v3265_v55  ;;  %v4389_v19 = vsub.f32 %v2987_v49, %v3101_v46  ;;  %v1018_v55 = vmul.f32 1.442695, %v4390_v38 }
 0x2fa   : > { %v3277_v14 = vpop.eup %2193  ;;  %2213 = vpow2.f32 %v990_v17  ;;  %v4391_v52 = vsub.f32 %v2993_v37, %v3101_v46  ;;  %v4392_v49 = vsub.f32 %v4355_v50, %v3138_v40  ;;  %v4394_v37 = vsub.f32 %v4356_v28, %v3138_v40 }
 0x2fb   : > { %v3282_v53 = vpop.eup %2195  ;;  %2215 = vpow2.f32 %v994_v57  ;;  %v1106_v2 = vpack.c.bf16 %v3277_v14, %v3272_v8  ;;  %v1016_v17 = vmul.f32 1.442695, %v4389_v19  ;;  %v4393_v14 = vsub.f32 %v2999_v24, %v3101_v46 }
 0x2fc   : > { %v3287_v54 = vpop.eup %2197  ;;  %2217 = vpow2.f32 %v998_v3  ;;  %v1020_v61 = vmul.f32 1.442695, %v4391_v52  ;;  %v1022_v36 = vmul.f32 1.442695, %v4392_v49  ;;  %v1026_v45 = vmul.f32 1.442695, %v4394_v37 }
 0x2fd   : > { %v3292_v6 = vpop.eup %2199  ;;  %2219 = vpow2.f32 %v1002_v42  ;;  %v1108_v23 = vpack.c.bf16 %v3287_v54, %v3282_v53  ;;  %v1024_v48 = vmul.f32 1.442695, %v4393_v14  ;;  %v4395_v50 = vsub.f32 %v3005_v39, %v3101_v46 }
 0x2fe   : > { %v3300_v10 = vpop.eup %2201  ;;  %2221 = vpow2.f32 %v1006_v22  ;;  %v4397_v28 = vsub.f32 %v3011_v35, %v3101_v46  ;;  %v4398_v39 = vsub.f32 %v4358_v31, %v3138_v40  ;;  %v4400_v35 = vsub.f32 %v4359_v43, %v3138_v40 }
 0x2ff   : > { %v2204_v26 = vpop.eup %2203  ;;  %2223 = vpow2.f32 %v1008_v56  ;;  %v1110_v9 = vpack.c.bf16 %v3300_v10, %v3292_v6  ;;  %v1028_v16 = vmul.f32 1.442695, %v4395_v50  ;;  %v4401_v31 = vsub.f32 %v3023_v34, %v3101_v46 }
 0x300   : > { %v2206_v1 = vpop.eup %2205  ;;  %2225 = vpow2.f32 %v1010_v58  ;;  %v1034_v19 = vmul.f32 1.442695, %v4398_v39  ;;  %v4404_v34 = vsub.f32 %v4361_v4, %v3138_v40  ;;  %v4407_v4 = vsub.f32 %v3041_v62, %v3101_v46 }
 0x301   : > { %v2208_v57 = vpop.eup %2207  ;;  %2227 = vpow2.f32 %v1012_v63  ;;  %v1103_v3 = vpack.c.bf16 %v2206_v1, %v2204_v26  ;;  %v1030_v63 = vmul.f32 1.442695, %v4396_v5  ;;  %v4399_v1 = vsub.f32 %v3017_v21, %v3101_v46  ;;  %v4410_v5 = vld [vmem:[#allocation55_spill] sm:$0xff] }
 0x302   : > { %v2210_v8 = vpop.eup %2209  ;;  %2229 = vpow2.f32 %v1014_v32  ;;  %v1032_v32 = vmul.f32 1.442695, %v4397_v28  ;;  %v4402_v21 = vsub.f32 %v4360_v27, %v3138_v40  ;;  %v4405_v27 = vsub.f32 %v3035_v7, %v3101_v46 }
 0x303   : > { %v2212_v42 = vpop.eup %2211  ;;  %2231 = vpow2.f32 %v1016_v17  ;;  %1134 = vmatprep.subr.bf16.mxu0 %v1103_v3  ;;  %v1105_v44 = vpack.c.bf16 %v2210_v8, %v2208_v57  ;;  %v1036_v29 = vmul.f32 1.442695, %v4399_v1  ;;  %v1038_v57 = vmul.f32 1.442695, %v4400_v35  ;;  %v4415_v1 = vld [vmem:[#allocation58_spill] sm:$0xff] }
 0x304   : > { %v2214_v22 = vpop.eup %2213  ;;  %2233 = vpow2.f32 %v1018_v55  ;;  %1135 = vmatpush1.bf16.msra.mxu0 %v1102_v30  ;;  %v1042_v3 = vmul.f32 1.442695, %v4402_v21  ;;  %v1052_v50 = vmul.f32 1.442695, %v4407_v4  ;;  %v4409_v53 = vsub.f32 %v3047_v18, %v3101_v46 }
 0x305   : > { %v2216_v56 = vpop.eup %2215  ;;  %2235 = vpow2.f32 %v1020_v61  ;;  %1136 = vmatprep.subr.bf16.mxu0 %v1105_v44  ;;  %v1107_v58 = vpack.c.bf16 %v2214_v22, %v2212_v42  ;;  %v1040_v61 = vmul.f32 1.442695, %v4401_v31  ;;  %v4411_v62 = vsub.f32 %v4410_v5, %v3138_v40 }
 0x306   : > { %v2218_v24 = vpop.eup %2217  ;;  %2237 = vpow2.f32 %v1022_v36  ;;  %v4403_v36 = vsub.f32 %v3029_v20, %v3101_v46  ;;  %v4406_v20 = vsub.f32 %v4362_v33, %v3138_v40  ;;  %v1056_v54 = vmul.f32 1.442695, %v4409_v53 }
 0x307   : > { %v2220_v41 = vpop.eup %2219  ;;  %2239 = vpow2.f32 %v1024_v48  ;;  %v1109_v30 = vpack.c.bf16 %v2218_v24, %v2216_v56  ;;  %v1046_v48 = vmul.f32 1.442695, %v4404_v34  ;;  %v4414_v39 = vsub.f32 %v4365_v13, %v3138_v40 }
 0x308   : > { %v2222_v26 = vpop.eup %2221  ;;  %2241 = vpow2.f32 %v1026_v45  ;;  %1137 = vmatpush1.bf16.msra.mxu0 %v1104_v12  ;;  %v1044_v43 = vmul.f32 1.442695, %v4403_v36  ;;  %v1050_v37 = vmul.f32 1.442695, %v4406_v20  ;;  %v4416_v6 = vsub.f32 %v4415_v1, %v3101_v46  ;;  %v4427_v20 = vld [vmem:[#allocation65_spill] sm:$0xff] }
 0x309   : > { %v2224_v17 = vpop.eup %2223  ;;  %2243 = vpow2.f32 %v1028_v16  ;;  %1138 = vmatprep.subr.bf16.mxu0 %v1107_v58  ;;  %v1111_v38 = vpack.c.bf16 %v2222_v26, %v2220_v41  ;;  %v4408_v58 = vsub.f32 %v4363_v0, %v3138_v40  ;;  %v4412_v0 = vld [vmem:[#allocation56_spill] sm:$0xff] }
 0x30a   : > { %v2226_v55 = vpop.eup %2225  ;;  %2245 = vpow2.f32 %v1030_v63  ;;  %v1058_v63 = vmul.f32 1.442695, %v4411_v62  ;;  %v1064_v10 = vmul.f32 1.442695, %v4416_v6 }
 0x30b   : > { %v2228_v52 = vpop.eup %2227  ;;  %2247 = vpow2.f32 %v1032_v32  ;;  %v1054_v33 = vmul.f32 1.442695, %v4408_v58  ;;  %v4413_v32 = vsub.f32 %v4412_v0, %v3101_v46  ;;  %v4431_v58 = vsub.f32 %v4370_v60, %v3138_v40 }
 0x30c   : > { %v2230_v12 = vpop.eup %2229  ;;  %2249 = vpow2.f32 %v1034_v19  ;;  %1139 = vmatpush1.bf16.msra.mxu0 %v1106_v2  ;;  %v1112_v8 = vpack.c.bf16 %v2228_v52, %v2224_v17  ;;  %v1048_v2 = vmul.f32 1.442695, %v4405_v27  ;;  %v1062_v19 = vmul.f32 1.442695, %v4414_v39 }
 0x30d   : > { %v2232_v49 = vpop.eup %2231  ;;  %2251 = vpow2.f32 %v1036_v29  ;;  %1140 = vmatprep.subr.bf16.mxu0 %v1109_v30  ;;  %v1113_v42 = vpack.c.bf16 %v2230_v12, %v2226_v55  ;;  %v1060_v30 = vmul.f32 1.442695, %v4413_v32  ;;  %v4417_v29 = vsub.f32 %v4366_v15, %v3138_v40 }
 0x30e   : > { %v2234_v14 = vpop.eup %2233  ;;  %2253 = vpow2.f32 %v1038_v57  ;;  %v4418_v57 = vld [vmem:[#allocation60_spill] sm:$0xff]  ;;  %v4420_v12 = vsub.f32 %v4367_v25, %v3138_v40 }
 0x30f   : > { %v2236_v44 = vpop.eup %2235  ;;  %2255 = vpow2.f32 %v1040_v61  ;;  %v4419_v52 = vsub.f32 %v4418_v57, %v3101_v46 }
 0x310   : > { %v2238_v22 = vpop.eup %2237  ;;  %2257 = vpow2.f32 %v1042_v3  ;;  %1141 = vmatpush1.bf16.msra.mxu0 %v1108_v23  ;;  %v1114_v45 = vpack.c.bf16 %v2236_v44, %v2232_v49  ;;  %v1070_v21 = vmul.f32 1.442695, %v4420_v12  ;;  %v4421_v49 = vld [vmem:[#allocation62_spill] sm:$0xff]  ;;  %v4425_v44 = vld [vmem:[#allocation64_spill] sm:$0xff] }
 0x311   : > { %v2240_v56 = vpop.eup %2239  ;;  %2259 = vpow2.f32 %v1044_v43  ;;  %1142 = vmatprep.subr.bf16.mxu0 %v1111_v38  ;;  %v1115_v7 = vpack.c.bf16 %v2238_v22, %v2234_v14  ;;  %v1066_v38 = vmul.f32 1.442695, %v4417_v29  ;;  %v1068_v13 = vmul.f32 1.442695, %v4419_v52  ;;  %v4423_v43 = vld [vmem:[#allocation63_spill] sm:$0xff] }
 0x312   : > { %v2242_v16 = vpop.eup %2241  ;;  %2261 = vpow2.f32 %v1046_v48  ;;  %v4422_v15 = vsub.f32 %v4421_v49, %v3101_v46  ;;  %v4426_v27 = vsub.f32 %v4425_v44, %v3101_v46  ;;  %v4447_v44 = vld [vmem:[#allocation17_spill] sm:$0xff] }
 0x313   : > { %v2244_v24 = vpop.eup %2243  ;;  %2263 = vpow2.f32 %v1048_v2 }
 0x314   : > { %v2246_v23 = vpop.eup %2245  ;;  %2265 = vpow2.f32 %v1050_v37  ;;  %1143 = vmatpush1.bf16.msra.mxu0 %v1110_v9  ;;  %v1116_v41 = vpack.c.bf16 %v2244_v24, %v2240_v56  ;;  %v1076_v25 = vmul.f32 1.442695, %v4426_v27  ;;  %v4428_v37 = vsub.f32 %v4427_v20, %v3138_v40 }
 0x315   : > { %v2248_v28 = vpop.eup %2247  ;;  %2267 = vpow2.f32 %v1052_v50  ;;  %1144 = vmatprep.subr.bf16.mxu0 %v1113_v42  ;;  %v1117_v18 = vpack.c.bf16 %v2246_v23, %v2242_v16  ;;  %v4424_v42 = vsub.f32 %v4423_v43, %v3138_v40  ;;  %v4429_v50 = vld [vmem:[#allocation66_spill] sm:$0xff] }
 0x316   : > { %v2250_v26 = vpop.eup %2249  ;;  %2269 = vpow2.f32 %v1054_v33  ;;  %v1078_v56 = vmul.f32 1.442695, %v4428_v37  ;;  %v1082_v33 = vmul.f32 1.442695, %v4431_v58  ;;  %v4440_v43 = vld [vmem:[#allocation10_spill] sm:$0xff]  ;;  %v4451_v37 = vld [vmem:[#allocation16_spill] sm:$0xff] }
 0x317   : > { %v2252_v17 = vpop.eup %2251  ;;  %2271 = vpow2.f32 %v1056_v54  ;;  %v1074_v14 = vmul.f32 1.442695, %v4424_v42  ;;  %v4432_v54 = vld [vmem:[#allocation68_spill] sm:$0xff] }
 0x318   : > { %v2254_v9 = vpop.eup %2253  ;;  %2273 = vpow2.f32 %v1058_v63  ;;  %1145 = vmatpush1.bf16.msra.mxu0 %v1112_v8  ;;  %v1118_v55 = vpack.c.bf16 %v2252_v17, %v2248_v28  ;;  %v1072_v8 = vmul.f32 1.442695, %v4422_v15  ;;  %v4433_v23 = vsub.f32 %v4432_v54, %v3101_v46  ;;  %v4456_v58 = vld [vmem:[#allocation24_spill] sm:$0xff]  ;;  %v4460_v54 = vld [vmem:[#allocation31_spill] sm:$0xff] }
 0x319   : > { %v2256_v35 = vpop.eup %2255  ;;  %2275 = vpow2.f32 %v1060_v30  ;;  %1146 = vmatprep.subr.bf16.mxu0 %v1115_v7  ;;  %v1119_v31 = vpack.c.bf16 %v2254_v9, %v2250_v26  ;;  %v4430_v7 = vsub.f32 %v4429_v50, %v3101_v46  ;;  %v4434_v28 = vsub.f32 %v4371_v11, %v3138_v40  ;;  %v4435_v30 = vld [vmem:[#allocation70_spill] sm:$0xff] }
 0x31a   : > { %v2258_v61 = vpop.eup %2257  ;;  %2277 = vpow2.f32 %v1062_v19  ;;  %v1084_v5 = vmul.f32 1.442695, %v4433_v23  ;;  %v4436_v60 = vsub.f32 %v4435_v30, %v3101_v46  ;;  %v4437_v26 = vsub.f32 %v3098_v59, %v3138_v40  ;;  %v4461_v23 = vld [vmem:[#allocation26_spill] sm:$0xff]  ;;  %v4468_v30 = vld [vmem:[#allocation37_spill] sm:$0xff] }
 0x31b   : > { %v2260_v3 = vpop.eup %2259  ;;  %2279 = vpow2.f32 %v1064_v10  ;;  %v1086_v0 = vmul.f32 1.442695, %v4434_v28  ;;  %v4452_v50 = vmov 0   ;;  %v4465_v28 = vld [vmem:[#allocation34_spill] sm:$0xff] }
 0x31c   : > { %v2262_v36 = vpop.eup %2261  ;;  %2281 = vpow2.f32 %v1066_v38  ;;  %1147 = vmatpush1.bf16.msra.mxu0 %v1114_v45  ;;  %v1120_v34 = vpack.c.bf16 %v2260_v3, %v2256_v35  ;;  %v1080_v45 = vmul.f32 1.442695, %v4430_v7  ;;  %v1090_v39 = vmul.f32 1.442695, %v4437_v26  ;;  %v4453_v7 = vld [vmem:[#allocation21_spill] sm:$0xff] }
 0x31d   : > { %v2264_v48 = vpop.eup %2263  ;;  %2283 = vpow2.f32 %v1068_v13  ;;  %1148 = vmatprep.subr.bf16.mxu0 %v1117_v18  ;;  %v1121_v2 = vpack.c.bf16 %v2262_v36, %v2258_v61  ;;  %v4439_v36 = vld [vmem:[#allocation11_spill] sm:$0xff] }
 0x31e   : > { %v2266_v22 = vpop.eup %2265  ;;  %2285 = vpow2.f32 %v1070_v21  ;;  %v4441_v42 = vpack.c.bf16 %v4439_v36, %v4440_v43  ;;  %v2443_v43 = vld [vmem:[%s2649_s11] sm:$0xff] }
 0x31f   : > { %v2268_v4 = vpop.eup %2267  ;;  %2287 = vpow2.f32 %v1072_v8  ;;  %v4438_v8 = vld [vmem:[#allocation8_spill] sm:$0xff] }
 0x320   : > { %v2270_v16 = vpop.eup %2269  ;;  %2289 = vpow2.f32 %v1074_v14  ;;  %1149 = vmatpush1.bf16.msra.mxu0 %v1116_v41  ;;  %v1122_v24 = vpack.c.bf16 %v2268_v4, %v2264_v48  ;;  %v1088_v41 = vmul.f32 1.442695, %v4436_v60  ;;  %v4442_v14 = vld [vmem:[#allocation15_spill] sm:$0xff] }
 0x321   : > { %v2272_v53 = vpop.eup %2271  ;;  %2291 = vpow2.f32 %v1076_v25  ;;  %1150 = vmatprep.subr.bf16.mxu0 %v1119_v31  ;;  %v1123_v62 = vpack.c.bf16 %v2270_v16, %v2266_v22  ;;  %v4449_v22 = vld [vmem:[#allocation12_spill] sm:$0xff]  ;;  %v4455_v16 = vld [vmem:[#allocation23_spill] sm:$0xff] }
 0x322   : > { %v2274_v63 = vpop.eup %2273  ;;  %2293 = vpow2.f32 %v1078_v56 }
 0x323   : > { %v2276_v32 = vpop.eup %2275  ;;  %2295 = vpow2.f32 %v1080_v45  ;;  %v4454_v45 = vld [vmem:[#allocation22_spill] sm:$0xff] }
 0x324   : > { %v2278_v18 = vpop.eup %2277  ;;  %2297 = vpow2.f32 %v1082_v33  ;;  %1151 = vmatpush1.bf16.msra.mxu0 %v1118_v55  ;;  %v1124_v19 = vpack.c.bf16 %v2276_v32, %v2272_v53  ;;  %v4457_v33 = vld [vmem:[#allocation25_spill] sm:$0xff]  ;;  %v4467_v32 = vld [vmem:[#allocation36_spill] sm:$0xff] }
 0x325   : > { %v2280_v17 = vpop.eup %2279  ;;  %2299 = vpow2.f32 %v1084_v5  ;;  %1152 = vmatprep.subr.bf16.mxu0 %v1121_v2  ;;  %v1125_v1 = vpack.c.bf16 %v2278_v18, %v2274_v63  ;;  %v4448_v2 = vld [vmem:[#allocation13_spill] sm:$0xff]  ;;  %v4462_v5 = vld [vmem:[#allocation28_spill] sm:$0xff] }
 0x326   : > { %v2282_v11 = vpop.eup %2281  ;;  %2301 = vpow2.f32 %v1086_v0  ;;  %v4450_v20 = vpack.c.bf16 %v4448_v2, %v4449_v22  ;;  %v4459_v53 = vld [vmem:[#allocation29_spill] sm:$0xff]  ;;  %v4464_v63 = vld [vmem:[#allocation32_spill] sm:$0xff]  ;;  %v4466_v0 = vld [vmem:[#allocation35_spill] sm:$0xff] }
 0x327   : > { %v2284_v6 = vpop.eup %2283  ;;  %2303 = vpow2.f32 %v1088_v41  ;;  %v2448_v22 = vld [vmem:[%s2649_s11 + $0x18] sm:$0xff] }
 0x328   : > { %v2286_v10 = vpop.eup %2285  ;;  %2305 = vpow2.f32 %v1090_v39  ;;  %1153 = vmatpush1.bf16.msra.mxu0 %v1120_v34  ;;  %v1126_v46 = vpack.c.bf16 %v2284_v6, %v2280_v17  ;;  %v4443_v34 = vld [vmem:[#allocation14_spill] sm:$0xff]  ;;  %v1197_v6 = vlaneseq }
 0x329   : > { %v2288_v9 = vpop.eup %2287  ;;  %1154 = vmatprep.subr.bf16.mxu0 %v1123_v62  ;;  %v1127_v29 = vpack.c.bf16 %v2286_v10, %v2282_v11  ;;  %v4444_v48 = vpack.c.bf16 %v4442_v14, %v4443_v34  ;;  %v4463_v62 = vld [vmem:[#allocation30_spill] sm:$0xff] }
 0x32a   : > { %v2290_v38 = vpop.eup %2289  ;;  %v2444_v14 = vld [vmem:[%s2649_s11 + $0x10] sm:$0xff] }
 0x32b   : > { %v2292_v59 = vpop.eup %2291 }
 0x32c   : > { %v2294_v40 = vpop.eup %2293  ;;  %1155 = vmatpush1.bf16.msra.mxu0 %v1122_v24  ;;  %v1128_v55 = vpack.c.bf16 %v2292_v59, %v2288_v9  ;;  %v4458_v24 = vld [vmem:[#allocation27_spill] sm:$0xff] }
 0x32d   : > { %v2296_v35 = vpop.eup %2295  ;;  %1156 = vmatprep.subr.bf16.mxu0 %v1125_v1  ;;  %v1129_v57 = vpack.c.bf16 %v2294_v40, %v2290_v38 }
 0x32e   : > { %v2298_v52 = vpop.eup %2297 }
 0x32f   : > { %v2300_v13 = vpop.eup %2299 }
 0x330   : > { %v2302_v31 = vpop.eup %2301  ;;  %1157 = vmatpush1.bf16.msra.mxu0 %v1124_v19  ;;  %v1130_v61 = vpack.c.bf16 %v2300_v13, %v2296_v35 }
 0x331   : > { %v2304_v12 = vpop.eup %2303  ;;  %1158 = vmatprep.subr.bf16.mxu0 %v1127_v29  ;;  %v1131_v21 = vpack.c.bf16 %v2302_v31, %v2298_v52  ;;  %v1198_v29 = vshrl.u32 %v1197_v6, 7 }
 0x332   : > { %v2306_v3 = vpop.eup %2305  ;;  %v1132_v49 = vpack.c.bf16 %v3261_v47, %v2304_v12  ;;  %v4445_v47 = vld [vmem:[#allocation9_spill] sm:$0xff] }
 0x333   : > { %v1133_v15 = vpack.c.bf16 %v3263_v51, %v2306_v3  ;;  %v4446_v51 = vld [vmem:[#allocation20_spill] sm:$0xff]  ;;  %v3496_v38 = vsub.s32 0, %v1198_v29 }
 0x334   : > { %1159 = vmatpush1.bf16.msra.mxu0 %v1126_v46  ;;  %v501_v27 = vadd.f32 %v4447_v44, %v4446_v51  ;;  %v499_v56 = vadd.f32 %v4451_v37, %v4446_v51  ;;  %v2446_v51 = vld [vmem:[%s2649_s11 + $0x30] sm:$0xff]  ;;  %v2449_v37 = vld [vmem:[%s2649_s11 + $0x28] sm:$0xff] }
 0x335   : > { %1160 = vmatprep.subr.bf16.mxu0 %v1129_v57  ;;  %4469 = vst [vmem:[#allocation43_spill] sm:$0xff] %v3496_v38 }
 0x336   : > { %v1101_v25 = vpack.c.bf16 %v501_v27, %v501_v27  ;;  %v1100_v4 = vpack.c.bf16 %v499_v56, %v499_v56 }
 0x338   : > { %1161 = vmatpush1.bf16.msra.mxu0 %v1128_v55 }
 0x339   : > { %1162 = vmatprep.subr.bf16.mxu0 %v1131_v21 }
 0x33c   : > { %1163 = vmatpush1.bf16.msra.mxu0 %v1130_v61 }
 0x33d   : > { %1164 = vmatprep.subr.bf16.mxu0 %v1133_v15 }
 0x340   : > { %1165 = vmatpush1.bf16.msra.mxu0 %v1132_v49 }
 0x341   : > { %2084 = vmatprep.subr.msk.bf16.mxu0 %vm630_vm1, %v4438_v8 }
 0x343   : > { %1167 = vmatmul.mubr.bf16.vlgmr.msra.gmra.mrb[0].mxu0 %v4441_v42 }
 0x344   : > { %1176 = vmatprep.mubr.bf16.mxu0 %v4444_v48  ;;  %1312 = vmatpush1.bf16.msra.mxu0 %v4445_v47  ;;  %v2445_v48 = vld [vmem:[%s2649_s11 + $0x20] sm:$0xff] }
 0x34b   : > { %1177 = vmatmul.mubr.bf16.gmra.mrb[4].mxu0 %v4450_v20 }
 0x34c   : > { %1186 = vmatprep.mubr.bf16.mxu0 %v1101_v25  ;;  %v2447_v25 = vld [vmem:[%s2649_s11 + $0x8] sm:$0xff] }
 0x353   : > { %1187 = vmatmul.mubr.bf16.gmra.mrb[8].mxu0 %v1100_v4  ;;  %v2450_v4 = vld [vmem:[%s2649_s11 + $0x38] sm:$0xff]  ;;  %s2111_s11 = sshll.u32 %s2612_s22, 10 }
 0x354   : > { %1343 = vmatprep.mubr.bf16.mxu0 %v4452_v50  ;;  %s4058_s13 = scalar_lea.hbm %s4170_s4, %s2111_s11 }
 0x35b   : > { %2085 = vmatmul.mubr.msk.bf16.vlgmr.msra.gmra.mrb[12].mxu0 %vm581_vm2, %v4453_v7 }
 0x35c   : > { %1353 = vmatprep.mubr.bf16.mxu0 %v4452_v50 }
 0x363   : > { %2086 = vmatmul.mubr.msk.bf16.gmra.mrb[16].mxu0 %vm581_vm2, %v4454_v45 }
 0x364   : > { %1363 = vmatprep.mubr.bf16.mxu0 %v4452_v50 }
 0x36b   : > { %2087 = vmatmul.mubr.msk.bf16.gmra.mrb[20].mxu0 %vm581_vm2, %v4455_v16 }
 0x36c   : > { %1373 = vmatprep.mubr.bf16.mxu0 %v4452_v50 }
 0x373   : > { %2088 = vmatmul.mubr.msk.bf16.gmra.mrb[24].mxu0 %vm581_vm2, %v4456_v58 }
 0x374   : > { %1383 = vmatprep.mubr.bf16.mxu0 %v4452_v50 }
 0x37b   : > { %2089 = vmatmul.mubr.msk.bf16.gmra.mrb[28].mxu0 %vm581_vm2, %v4457_v33 }
 0x37c   : > { %1393 = vmatprep.mubr.bf16.mxu0 %v4452_v50 }
 0x383   : > { %2090 = vmatmul.mubr.msk.bf16.gmra.mrb[32].mxu0 %vm581_vm2, %v4458_v24 }
 0x384   : > { %1403 = vmatprep.mubr.bf16.mxu0 %v4452_v50 }
 0x38b   : > { %2091 = vmatmul.mubr.msk.bf16.gmra.mrb[36].mxu0 %vm581_vm2, %v4459_v53 }
 0x38c   : > { %1413 = vmatprep.mubr.bf16.mxu0 %v4452_v50 }
 0x393   : > { %2092 = vmatmul.mubr.msk.bf16.gmra.mrb[40].mxu0 %vm581_vm2, %v4460_v54 }
 0x394   : > { %1423 = vmatprep.mubr.bf16.mxu0 %v4452_v50 }
 0x39b   : > { %2093 = vmatmul.mubr.msk.bf16.gmra.mrb[44].mxu0 %vm581_vm2, %v4461_v23 }
 0x39c   : > { %1433 = vmatprep.mubr.bf16.mxu0 %v4452_v50 }
 0x3a3   : > { %2094 = vmatmul.mubr.msk.bf16.gmra.mrb[48].mxu0 %vm581_vm2, %v4462_v5 }
 0x3a4   : > { %1443 = vmatprep.mubr.bf16.mxu0 %v4452_v50 }
 0x3ab   : > { %2095 = vmatmul.mubr.msk.bf16.gmra.mrb[52].mxu0 %vm581_vm2, %v4463_v62 }
 0x3ac   : > { %1453 = vmatprep.mubr.bf16.mxu0 %v4452_v50 }
 0x3b3   : > { %2096 = vmatmul.mubr.msk.bf16.gmra.mrb[56].mxu0 %vm581_vm2, %v4464_v63 }
 0x3b4   : > { %1463 = vmatprep.mubr.bf16.mxu0 %v4452_v50 }
 0x3bb   : > { %2097 = vmatmul.mubr.msk.bf16.gmra.mrb[60].mxu0 %vm581_vm2, %v4465_v28 }
 0x3bc   : > { %1473 = vmatprep.mubr.bf16.mxu0 %v4452_v50 }
 0x3c3   : > { %2098 = vmatmul.mubr.msk.bf16.gmra.mrb[64].mxu0 %vm581_vm2, %v4466_v0 }
 0x3c4   : > { %1483 = vmatprep.mubr.bf16.mxu0 %v4452_v50 }
 0x3cb   : > { %2099 = vmatmul.mubr.msk.bf16.gmra.mrb[68].mxu0 %vm581_vm2, %v4467_v32 }
 0x3cc   : > { %1493 = vmatprep.mubr.bf16.mxu0 %v4452_v50 }
 0x3d3   : > { %2100 = vmatmul.mubr.msk.bf16.gmra.mrb[72].mxu0 %vm581_vm2, %v4468_v30 }
 0x416   : > { %v1168_v60 = vpop.f32.mrb[0].mxu0 }
 0x417   : > { %v1170_v41 = vpop.f32.mrb[1].mxu0 }
 0x418   : > { %v1172_v18 = vpop.f32.mrb[2].mxu0 }
 0x419   : > { %v1174_v26 = vpop.f32.mrb[3].mxu0 }
 0x41e   : > { %v1178_v39 = vpop.f32.mrb[4].mxu0 }
 0x41f   : > { %v1180_v19 = vpop.f32.mrb[5].mxu0 }
 0x420   : > { %v1182_v17 = vpop.f32.mrb[6].mxu0 }
 0x421   : > { %v1184_v1 = vpop.f32.mrb[7].mxu0 }
 0x426   : > { %v1188_v11 = vpop.f32.mrb[8].mxu0 }
 0x427   : > { %2307 = vrcp.f32 %v1188_v11  ;;  %v1190_v10 = vpop.f32.mrb[9].mxu0 }
 0x428   : > { %2309 = vrcp.f32 %v1190_v10  ;;  %v1192_v46 = vpop.f32.mrb[10].mxu0 }
 0x429   : > { %v1193_v9 = vpop.f32.mrb[11].mxu0 }
 0x42e   : > { %v3498_v59 = vpop.f32.mrb[12].mxu0 }
 0x42f   : > { %v3503_v40 = vpop.f32.mrb[13].mxu0 }
 0x430   : > { %v3505_v55 = vpop.f32.mrb[14].mxu0 }
 0x431   : > { %v2308_v35 = vpop.eup %2307  ;;  %v3507_v57 = vpop.f32.mrb[15].mxu0 }
 0x432   : > { %v2310_v52 = vpop.eup %2309  ;;  %v1200_v13 = vrot.slane %v2308_v35, %v3496_v38 }
 0x433   : > { %v1204_v31 = vrot.slane %v2310_v52, %v3496_v38 }
 0x434   : > { %v1205_v61 = vmul.f32 %v1200_v13, %v1168_v60  ;;  %v1207_v12 = vmul.f32 %v1200_v13, %v1172_v18  ;;  %v1209_v21 = vmul.f32 %v1200_v13, %v1178_v39  ;;  %v1211_v3 = vmul.f32 %v1200_v13, %v1182_v17 }
 0x435   : > { %v1206_v49 = vmul.f32 %v1204_v31, %v1170_v41  ;;  %v1208_v15 = vmul.f32 %v1204_v31, %v1174_v26  ;;  %v1210_v8 = vmul.f32 %v1204_v31, %v1180_v19  ;;  %v1212_v36 = vmul.f32 %v1204_v31, %v1184_v1 }
 0x436   : > { %v1213_v42 = vadd.f32 %v2443_v43, %v1205_v61  ;;  %v1215_v34 = vadd.f32 %v2444_v14, %v1207_v12  ;;  %v1217_v47 = vadd.f32 %v2445_v48, %v1209_v21  ;;  %v1219_v44 = vadd.f32 %v2446_v51, %v1211_v3  ;;  %v3516_v27 = vpop.f32.mrb[16].mxu0 }
 0x437   : > { %v1214_v2 = vadd.f32 %v2447_v25, %v1206_v49  ;;  %v1216_v20 = vadd.f32 %v2448_v22, %v1208_v15  ;;  %v1218_v56 = vadd.f32 %v2449_v37, %v1210_v8  ;;  %v1220_v50 = vadd.f32 %v2450_v4, %v1212_v36  ;;  %v3522_v7 = vpop.f32.mrb[17].mxu0 }
 0x438   : > { %1221 = vst [vmem:[%s3526_s9] sm:$0xff] %v1213_v42  ;;  %1223 = vst [vmem:[%s3526_s9 + $0x10] sm:$0xff] %v1215_v34  ;;  %v1504_v45 = vmax.f32 %v3498_v59, %v3516_v27  ;;  %v1541_v16 = vmax.f32 %v3503_v40, %v3522_v7  ;;  %v3536_v58 = vpop.f32.mrb[18].mxu0 }
 0x439   : > { %1225 = vst [vmem:[%s3526_s9 + $0x20] sm:$0xff] %v1217_v47  ;;  %1227 = vst [vmem:[%s3526_s9 + $0x30] sm:$0xff] %v1219_v44  ;;  %v1505_v33 = vmax.f32 %v3505_v55, %v3536_v58  ;;  %v3544_v24 = vpop.f32.mrb[19].mxu0 }
 0x43a   : > { %1222 = vst [vmem:[%s3526_s9 + $0x8] sm:$0xff] %v1214_v2  ;;  %1224 = vst [vmem:[%s3526_s9 + $0x18] sm:$0xff] %v1216_v20  ;;  %v1542_v53 = vmax.f32 %v3507_v57, %v3544_v24 }
 0x43b   : > { %1226 = vst [vmem:[%s3526_s9 + $0x28] sm:$0xff] %v1218_v56  ;;  %1228 = vst [vmem:[%s3526_s9 + $0x38] sm:$0xff] %v1220_v50 }
 0x43e   : > { %v3548_v54 = vpop.f32.mrb[20].mxu0 }
 0x43f   : > { %v1506_v23 = vmax.f32 %v1504_v45, %v3548_v54  ;;  %v3551_v5 = vpop.f32.mrb[21].mxu0 }
 0x440   : > { %v1543_v62 = vmax.f32 %v1541_v16, %v3551_v5  ;;  %v3554_v63 = vpop.f32.mrb[22].mxu0 }
 0x441   : > { %v1507_v28 = vmax.f32 %v1505_v33, %v3554_v63  ;;  %v3557_v0 = vpop.f32.mrb[23].mxu0 }
 0x442   : > { %v1544_v32 = vmax.f32 %v1542_v53, %v3557_v0 }
 0x446   : > { %v3560_v30 = vpop.f32.mrb[24].mxu0 }
 0x447   : > { %v1508_v60 = vmax.f32 %v1506_v23, %v3560_v30  ;;  %v3563_v41 = vpop.f32.mrb[25].mxu0 }
 0x448   : > { %v1545_v18 = vmax.f32 %v1543_v62, %v3563_v41  ;;  %v3566_v26 = vpop.f32.mrb[26].mxu0 }
 0x449   : > { %v1509_v39 = vmax.f32 %v1507_v28, %v3566_v26  ;;  %v3569_v19 = vpop.f32.mrb[27].mxu0 }
 0x44a   : > { %v1546_v17 = vmax.f32 %v1544_v32, %v3569_v19 }
 0x44e   : > { %v3572_v1 = vpop.f32.mrb[28].mxu0 }
 0x44f   : > { %v1510_v11 = vmax.f32 %v1508_v60, %v3572_v1  ;;  %v3575_v6 = vpop.f32.mrb[29].mxu0 }
 0x450   : > { %v1547_v10 = vmax.f32 %v1545_v18, %v3575_v6  ;;  %v3578_v46 = vpop.f32.mrb[30].mxu0 }
 0x451   : > { %v1511_v9 = vmax.f32 %v1509_v39, %v3578_v46  ;;  %v3581_v29 = vpop.f32.mrb[31].mxu0 }
 0x452   : > { %v1548_v35 = vmax.f32 %v1546_v17, %v3581_v29 }
 0x456   : > { %v3584_v52 = vpop.f32.mrb[32].mxu0 }
 0x457   : > { %v1512_v13 = vmax.f32 %v1510_v11, %v3584_v52  ;;  %v3587_v31 = vpop.f32.mrb[33].mxu0 }
 0x458   : > { %4470 = vst [vmem:[#allocation44_spill] sm:$0xff] %v3587_v31  ;;  %v1549_v61 = vmax.f32 %v1547_v10, %v3587_v31  ;;  %v3590_v12 = vpop.f32.mrb[34].mxu0 }
 0x459   : > { %v1513_v21 = vmax.f32 %v1511_v9, %v3590_v12  ;;  %v3593_v3 = vpop.f32.mrb[35].mxu0 }
 0x45a   : > { %4471 = vst [vmem:[#allocation45_spill] sm:$0xff] %v3593_v3  ;;  %v1550_v49 = vmax.f32 %v1548_v35, %v3593_v3 }
 0x45e   : > { %v3596_v15 = vpop.f32.mrb[36].mxu0 }
 0x45f   : > { %v1514_v8 = vmax.f32 %v1512_v13, %v3596_v15  ;;  %v3599_v36 = vpop.f32.mrb[37].mxu0 }
 0x460   : > { %4472 = vst [vmem:[#allocation46_spill] sm:$0xff] %v3599_v36  ;;  %v1551_v43 = vmax.f32 %v1549_v61, %v3599_v36  ;;  %v3602_v42 = vpop.f32.mrb[38].mxu0 }
 0x461   : > { %v1515_v14 = vmax.f32 %v1513_v21, %v3602_v42  ;;  %v3605_v34 = vpop.f32.mrb[39].mxu0 }
 0x462   : > { %4473 = vst [vmem:[#allocation47_spill] sm:$0xff] %v3605_v34  ;;  %v1552_v48 = vmax.f32 %v1550_v49, %v3605_v34 }
 0x466   : > { %v3608_v47 = vpop.f32.mrb[40].mxu0 }
 0x467   : > { %v1516_v51 = vmax.f32 %v1514_v8, %v3608_v47  ;;  %v3611_v44 = vpop.f32.mrb[41].mxu0 }
 0x468   : > { %4474 = vst [vmem:[#allocation48_spill] sm:$0xff] %v3611_v44  ;;  %v1553_v25 = vmax.f32 %v1551_v43, %v3611_v44  ;;  %v3614_v2 = vpop.f32.mrb[42].mxu0 }
 0x469   : > { %v1517_v22 = vmax.f32 %v1515_v14, %v3614_v2  ;;  %v3617_v20 = vpop.f32.mrb[43].mxu0 }
 0x46a   : > { %4475 = vst [vmem:[#allocation49_spill] sm:$0xff] %v3617_v20  ;;  %v1554_v37 = vmax.f32 %v1552_v48, %v3617_v20 }
 0x46e   : > { %v3620_v56 = vpop.f32.mrb[44].mxu0 }
 0x46f   : > { %v1518_v4 = vmax.f32 %v1516_v51, %v3620_v56  ;;  %v3623_v50 = vpop.f32.mrb[45].mxu0 }
 0x470   : > { %4476 = vst [vmem:[#allocation50_spill] sm:$0xff] %v3623_v50  ;;  %v1555_v45 = vmax.f32 %v1553_v25, %v3623_v50  ;;  %v3626_v16 = vpop.f32.mrb[46].mxu0 }
 0x471   : > { %v1519_v33 = vmax.f32 %v1517_v22, %v3626_v16  ;;  %v3629_v53 = vpop.f32.mrb[47].mxu0 }
 0x472   : > { %4477 = vst [vmem:[#allocation51_spill] sm:$0xff] %v3629_v53  ;;  %v1556_v23 = vmax.f32 %v1554_v37, %v3629_v53 }
 0x476   : > { %v3632_v62 = vpop.f32.mrb[48].mxu0 }
 0x477   : > { %v1520_v28 = vmax.f32 %v1518_v4, %v3632_v62  ;;  %v3635_v32 = vpop.f32.mrb[49].mxu0 }
 0x478   : > { %4478 = vst [vmem:[#allocation52_spill] sm:$0xff] %v3635_v32  ;;  %v1557_v60 = vmax.f32 %v1555_v45, %v3635_v32  ;;  %v3638_v18 = vpop.f32.mrb[50].mxu0 }
 0x479   : > { %v1521_v39 = vmax.f32 %v1519_v33, %v3638_v18  ;;  %v3641_v17 = vpop.f32.mrb[51].mxu0 }
 0x47a   : > { %4479 = vst [vmem:[#allocation53_spill] sm:$0xff] %v3641_v17  ;;  %v1558_v11 = vmax.f32 %v1556_v23, %v3641_v17 }
 0x47e   : > { %v3644_v10 = vpop.f32.mrb[52].mxu0 }
 0x47f   : > { %v1522_v9 = vmax.f32 %v1520_v28, %v3644_v10  ;;  %v3647_v35 = vpop.f32.mrb[53].mxu0 }
 0x480   : > { %4480 = vst [vmem:[#allocation54_spill] sm:$0xff] %v3647_v35  ;;  %v1559_v13 = vmax.f32 %v1557_v60, %v3647_v35  ;;  %v3650_v61 = vpop.f32.mrb[54].mxu0 }
 0x481   : > { %v1523_v21 = vmax.f32 %v1521_v39, %v3650_v61  ;;  %v3653_v49 = vpop.f32.mrb[55].mxu0 }
 0x482   : > { %4481 = vst [vmem:[#allocation57_spill] sm:$0xff] %v3653_v49  ;;  %v1560_v8 = vmax.f32 %v1558_v11, %v3653_v49 }
 0x486   : > { %v3656_v43 = vpop.f32.mrb[56].mxu0 }
 0x487   : > { %v1524_v14 = vmax.f32 %v1522_v9, %v3656_v43  ;;  %v3659_v48 = vpop.f32.mrb[57].mxu0 }
 0x488   : > { %4482 = vst [vmem:[#allocation59_spill] sm:$0xff] %v3659_v48  ;;  %v1561_v51 = vmax.f32 %v1559_v13, %v3659_v48  ;;  %v3662_v25 = vpop.f32.mrb[58].mxu0 }
 0x489   : > { %4483 = vst [vmem:[#allocation61_spill] sm:$0xff] %v3662_v25  ;;  %v1525_v22 = vmax.f32 %v1523_v21, %v3662_v25  ;;  %v3665_v37 = vpop.f32.mrb[59].mxu0 }
 0x48a   : > { %4484 = vst [vmem:[#allocation67_spill] sm:$0xff] %v3665_v37  ;;  %v1562_v4 = vmax.f32 %v1560_v8, %v3665_v37 }
 0x48e   : > { %v3668_v45 = vpop.f32.mrb[60].mxu0 }
 0x48f   : > { %4485 = vst [vmem:[#allocation69_spill] sm:$0xff] %v3668_v45  ;;  %v1526_v33 = vmax.f32 %v1524_v14, %v3668_v45  ;;  %v3671_v23 = vpop.f32.mrb[61].mxu0 }
 0x490   : > { %4486 = vst [vmem:[#allocation55_spill] sm:$0xff] %v3671_v23  ;;  %v1563_v28 = vmax.f32 %v1561_v51, %v3671_v23  ;;  %v3674_v60 = vpop.f32.mrb[62].mxu0 }
 0x491   : > { %4487 = vst [vmem:[#allocation56_spill] sm:$0xff] %v3674_v60  ;;  %v1527_v39 = vmax.f32 %v1525_v22, %v3674_v60  ;;  %v3677_v11 = vpop.f32.mrb[63].mxu0 }
 0x492   : > { %4488 = vst [vmem:[#allocation58_spill] sm:$0xff] %v3677_v11  ;;  %v1564_v9 = vmax.f32 %v1562_v4, %v3677_v11 }
 0x496   : > { %v3680_v13 = vpop.f32.mrb[64].mxu0 }
 0x497   : > { %4489 = vst [vmem:[#allocation60_spill] sm:$0xff] %v3680_v13  ;;  %v1528_v21 = vmax.f32 %v1526_v33, %v3680_v13  ;;  %v3683_v8 = vpop.f32.mrb[65].mxu0 }
 0x498   : > { %4490 = vst [vmem:[#allocation62_spill] sm:$0xff] %v3683_v8  ;;  %v1565_v14 = vmax.f32 %v1563_v28, %v3683_v8  ;;  %v3686_v38 = vpop.f32.mrb[66].mxu0 }
 0x499   : > { %4491 = vst [vmem:[#allocation63_spill] sm:$0xff] %v3686_v38  ;;  %v1529_v51 = vmax.f32 %v1527_v39, %v3686_v38  ;;  %v3689_v23 = vpop.f32.mrb[67].mxu0 }
 0x49a   : > { %4492 = vst [vmem:[#allocation64_spill] sm:$0xff] %v3689_v23  ;;  %v1566_v22 = vmax.f32 %v1564_v9, %v3689_v23 }
 0x49e   : > { %v3692_v37 = vpop.f32.mrb[68].mxu0 }
 0x49f   : > { %4493 = vst [vmem:[#allocation65_spill] sm:$0xff] %v3692_v37  ;;  %v1530_v4 = vmax.f32 %v1528_v21, %v3692_v37  ;;  %v3695_v11 = vpop.f32.mrb[69].mxu0 }
 0x4a0   : > { %4494 = vst [vmem:[#allocation66_spill] sm:$0xff] %v3695_v11  ;;  %v1567_v33 = vmax.f32 %v1565_v14, %v3695_v11  ;;  %v3698_v48 = vpop.f32.mrb[70].mxu0 }
 0x4a1   : > { %4495 = vst [vmem:[#allocation68_spill] sm:$0xff] %v3698_v48  ;;  %v1531_v28 = vmax.f32 %v1529_v51, %v3698_v48  ;;  %v3701_v8 = vpop.f32.mrb[71].mxu0 }
 0x4a2   : > { %4496 = vst [vmem:[#allocation70_spill] sm:$0xff] %v3701_v8  ;;  %v1568_v39 = vmax.f32 %v1566_v22, %v3701_v8 }
 0x4a6   : > { %v3704_v49 = vpop.f32.mrb[72].mxu0 }
 0x4a7   : > { %4497 = vst [vmem:[#allocation8_spill] sm:$0xff] %v3704_v49  ;;  %v1532_v9 = vmax.f32 %v1530_v4, %v3704_v49  ;;  %v3707_v23 = vpop.f32.mrb[73].mxu0  ;;  %v4516_v49 = vld [vmem:[#allocation66_spill] sm:$0xff] }
 0x4a8   : > { %v1569_v21 = vmax.f32 %v1567_v33, %v3707_v23  ;;  %v1499_v35 = vpop.f32.mrb[74].mxu0 }
 0x4a9   : > { %v1533_v17 = vmax.f32 %v1531_v28, %v1499_v35  ;;  %v1501_v32 = vpop.f32.mrb[75].mxu0  ;;  %v4517_v48 = vld [vmem:[#allocation70_spill] sm:$0xff] }
 0x4aa   : > { %v1570_v14 = vmax.f32 %v1568_v39, %v1501_v32 }
 0x4ab   : > { %v1534_v11 = vmax.f32 %v1532_v9, %v1533_v17 }
 0x4ac   : > { %v1571_v53 = vmax.f32 %v1569_v21, %v1570_v14 }
 0x4ad   : > { %v1535_v50 = vrot.slane %v1534_v11, 4 }
 0x4ae   : > { %v1572_v51 = vrot.slane %v1571_v53, 4 }
 0x4af   : > { %v1536_v20 = vmax.f32 %v1534_v11, %v1535_v50  ;;  %v4512_v50 = vld [vmem:[#allocation55_spill] sm:$0xff] }
 0x4b0   : > { %v1573_v44 = vmax.f32 %v1571_v53, %v1572_v51  ;;  %v4511_v53 = vld [vmem:[#allocation67_spill] sm:$0xff] }
 0x4b1   : > { %v1537_v34 = vrot.slane %v1536_v20, 2 }
 0x4b2   : > { %v1574_v22 = vrot.slane %v1573_v44, 2 }
 0x4b3   : > { %v1538_v8 = vmax.f32 %v1536_v20, %v1537_v34  ;;  %v4507_v20 = vld [vmem:[#allocation53_spill] sm:$0xff] }
 0x4b4   : > { %v1575_v36 = vmax.f32 %v1573_v44, %v1574_v22  ;;  %v4508_v44 = vld [vmem:[#allocation54_spill] sm:$0xff] }
 0x4b5   : > { %v1539_v3 = vrot.slane %v1538_v8, 1 }
 0x4b6   : > { %v1576_v31 = vrot.slane %v1575_v36, 1 }
 0x4b7   : > { %v3710_v4 = vmax.f32 %v1538_v8, %v1539_v3  ;;  %v4505_v8 = vld [vmem:[#allocation51_spill] sm:$0xff]  ;;  %v4509_v3 = vld [vmem:[#allocation57_spill] sm:$0xff] }
 0x4b8   : > { %v3747_v11 = vmax.f32 %v1575_v36, %v1576_v31 }
 0x4b9   : > { %v1640_v33 = vsub.f32 %v1499_v35, %v3710_v4  ;;  %v4518_v38 = vsub.f32 %v3498_v59, %v3710_v4  ;;  %v4519_v60 = vsub.f32 %v3505_v55, %v3710_v4  ;;  %v4520_v45 = vsub.f32 %v3516_v27, %v3710_v4 }
 0x4ba   : > { %v1641_v36 = vsub.f32 %v1501_v32, %v3747_v11  ;;  %v1579_v9 = vsub.f32 %v3503_v40, %v3747_v11  ;;  %v1581_v21 = vsub.f32 %v3507_v57, %v3747_v11  ;;  %v1583_v14 = vsub.f32 %v3522_v7, %v3747_v11  ;;  %v4502_v40 = vld [vmem:[#allocation48_spill] sm:$0xff]  ;;  %v4503_v57 = vld [vmem:[#allocation49_spill] sm:$0xff]  ;;  %v4504_v7 = vld [vmem:[#allocation50_spill] sm:$0xff] }
 0x4bb   : > { %v1585_v51 = vsub.f32 %v3544_v24, %v3747_v11  ;;  %v1587_v22 = vsub.f32 %v3551_v5, %v3747_v11  ;;  %v1766_v39 = vmul.f32 1.442695, %v1640_v33  ;;  %v1589_v31 = vsub.f32 %v3557_v0, %v3747_v11  ;;  %v4498_v24 = vld [vmem:[#allocation44_spill] sm:$0xff]  ;;  %v4499_v5 = vld [vmem:[#allocation45_spill] sm:$0xff]  ;;  %v4500_v0 = vld [vmem:[#allocation46_spill] sm:$0xff] }
 0x4bc   : > { %v1591_v32 = vsub.f32 %v3563_v41, %v3747_v11  ;;  %v1768_v35 = vmul.f32 1.442695, %v1641_v36  ;;  %v4501_v41 = vld [vmem:[#allocation47_spill] sm:$0xff]  ;;  %v4506_v36 = vld [vmem:[#allocation52_spill] sm:$0xff]  ;;  %v4513_v33 = vld [vmem:[#allocation58_spill] sm:$0xff]  ;;  %v4521_v34 = vsub.f32 %v3536_v58, %v3710_v4  ;;  %v4524_v55 = vsub.f32 %v3560_v30, %v3710_v4 }
 0x4bd   : > { %2311 = vpow2.f32 %v1766_v39  ;;  %v1642_v13 = vmul.f32 1.442695, %v4518_v38  ;;  %v1646_v17 = vmul.f32 1.442695, %v4519_v60  ;;  %v1650_v28 = vmul.f32 1.442695, %v4520_v45 }
 0x4be   : > { %2313 = vpow2.f32 %v1768_v35  ;;  %v1654_v25 = vmul.f32 1.442695, %v4521_v34  ;;  %v4522_v39 = vsub.f32 %v3548_v54, %v3710_v4  ;;  %v4523_v38 = vsub.f32 %v3554_v63, %v3710_v4 }
 0x4bf   : > { %2315 = vpow2.f32 %v1642_v13  ;;  %v1666_v27 = vmul.f32 1.442695, %v4524_v55  ;;  %v4525_v45 = vsub.f32 %v3566_v26, %v3710_v4  ;;  %v4526_v54 = vsub.f32 %v3572_v1, %v3710_v4 }
 0x4c0   : > { %v1658_v37 = vmul.f32 1.442695, %v4522_v39  ;;  %v1662_v59 = vmul.f32 1.442695, %v4523_v38  ;;  %2317 = vpow2.f32 %v1646_v17  ;;  %v4527_v63 = vsub.f32 %v3578_v46, %v3710_v4 }
 0x4c1   : > { %2319 = vpow2.f32 %v1650_v28  ;;  %v1670_v58 = vmul.f32 1.442695, %v4525_v45  ;;  %v1674_v60 = vmul.f32 1.442695, %v4526_v54  ;;  %v1644_v28 = vmul.f32 1.442695, %v1579_v9 }
 0x4c2   : > { %2321 = vpow2.f32 %v1654_v25  ;;  %v1678_v13 = vmul.f32 1.442695, %v4527_v63  ;;  %v1648_v17 = vmul.f32 1.442695, %v1581_v21  ;;  %v1652_v25 = vmul.f32 1.442695, %v1583_v14 }
 0x4c3   : > { %2323 = vpow2.f32 %v1658_v37  ;;  %v1656_v34 = vmul.f32 1.442695, %v1585_v51  ;;  %v1660_v37 = vmul.f32 1.442695, %v1587_v22  ;;  %v1664_v46 = vmul.f32 1.442695, %v1589_v31 }
 0x4c4   : > { %2325 = vpow2.f32 %v1662_v59  ;;  %v1668_v38 = vmul.f32 1.442695, %v1591_v32  ;;  %v4528_v9 = vsub.f32 %v3569_v19, %v3747_v11  ;;  %v4529_v51 = vsub.f32 %v3575_v6, %v3747_v11 }
 0x4c5   : > { %2327 = vpow2.f32 %v1666_v27  ;;  %v4530_v31 = vsub.f32 %v3581_v29, %v3747_v11  ;;  %v4531_v19 = vsub.f32 %v3584_v52, %v3710_v4  ;;  %v4532_v6 = vsub.f32 %v4498_v24, %v3747_v11 }
 0x4c6   : > { %2329 = vpow2.f32 %v1670_v58  ;;  %v1672_v21 = vmul.f32 1.442695, %v4528_v9  ;;  %v1676_v22 = vmul.f32 1.442695, %v4529_v51  ;;  %v4533_v29 = vsub.f32 %v3590_v12, %v3710_v4 }
 0x4c7   : > { %v3870_v30 = vpop.eup %2311  ;;  %2331 = vpow2.f32 %v1674_v60  ;;  %v1680_v32 = vmul.f32 1.442695, %v4530_v31  ;;  %v1682_v45 = vmul.f32 1.442695, %v4531_v19  ;;  %v1684_v54 = vmul.f32 1.442695, %v4532_v6 }
 0x4c8   : > { %v3872_v26 = vpop.eup %2313  ;;  %2333 = vpow2.f32 %v1678_v13  ;;  %v1686_v63 = vmul.f32 1.442695, %v4533_v29  ;;  %v4534_v13 = vsub.f32 %v4499_v5, %v3747_v11  ;;  %v4542_v29 = vsub.f32 %v4503_v57, %v3747_v11 }
 0x4c9   : > { %v2316_v1 = vpop.eup %2315  ;;  %2335 = vpow2.f32 %v1644_v28 }
 0x4ca   : > { %v2318_v35 = vpop.eup %2317  ;;  %2337 = vpow2.f32 %v1648_v17  ;;  %v1688_v52 = vmul.f32 1.442695, %v4534_v13 }
 0x4cb   : > { %v3874_v39 = vpop.eup %2319  ;;  %2339 = vpow2.f32 %v1652_v25  ;;  %v1776_v28 = vpack.c.bf16 %v2318_v35, %v2316_v1  ;;  %v4536_v35 = vsub.f32 %v4500_v0, %v3747_v11 }
 0x4cc   : > { %v3876_v59 = vpop.eup %2321  ;;  %2341 = vpow2.f32 %v1656_v34 }
 0x4cd   : > { %v3881_v14 = vpop.eup %2323  ;;  %2343 = vpow2.f32 %v1660_v37  ;;  %v1778_v25 = vpack.c.bf16 %v3876_v59, %v3874_v39  ;;  %v4535_v37 = vsub.f32 %v3596_v15, %v3710_v4  ;;  %v1692_v39 = vmul.f32 1.442695, %v4536_v35 }
 0x4ce   : > { %v3886_v55 = vpop.eup %2325  ;;  %2345 = vpow2.f32 %v1664_v46  ;;  %v4537_v59 = vsub.f32 %v3602_v42, %v3710_v4  ;;  %v4538_v15 = vsub.f32 %v4501_v41, %v3747_v11  ;;  %v4540_v42 = vsub.f32 %v4502_v40, %v3747_v11 }
 0x4cf   : > { %v3891_v27 = vpop.eup %2327  ;;  %2347 = vpow2.f32 %v1668_v38  ;;  %v1780_v24 = vpack.c.bf16 %v3886_v55, %v3881_v14  ;;  %v1690_v46 = vmul.f32 1.442695, %v4535_v37  ;;  %v4539_v55 = vsub.f32 %v3608_v47, %v3710_v4 }
 0x4d0   : > { %v3896_v58 = vpop.eup %2329  ;;  %2349 = vpow2.f32 %v1672_v21  ;;  %v1694_v9 = vmul.f32 1.442695, %v4537_v59  ;;  %v1696_v51 = vmul.f32 1.442695, %v4538_v15  ;;  %v1700_v19 = vmul.f32 1.442695, %v4540_v42 }
 0x4d1   : > { %v3901_v60 = vpop.eup %2331  ;;  %2351 = vpow2.f32 %v1676_v22  ;;  %v1782_v34 = vpack.c.bf16 %v3896_v58, %v3891_v27  ;;  %v1698_v31 = vmul.f32 1.442695, %v4539_v55  ;;  %v4541_v41 = vsub.f32 %v3614_v2, %v3710_v4 }
 0x4d2   : > { %v3909_v17 = vpop.eup %2333  ;;  %2353 = vpow2.f32 %v1680_v32  ;;  %v4543_v40 = vsub.f32 %v3620_v56, %v3710_v4  ;;  %v4544_v2 = vsub.f32 %v4504_v7, %v3747_v11  ;;  %v4546_v56 = vsub.f32 %v4505_v8, %v3747_v11 }
 0x4d3   : > { %v2336_v12 = vpop.eup %2335  ;;  %2355 = vpow2.f32 %v1682_v45  ;;  %v1784_v5 = vpack.c.bf16 %v3909_v17, %v3901_v60  ;;  %v1702_v6 = vmul.f32 1.442695, %v4541_v41  ;;  %v4547_v7 = vsub.f32 %v3632_v62, %v3710_v4 }
 0x4d4   : > { %v2338_v1 = vpop.eup %2337  ;;  %2357 = vpow2.f32 %v1684_v54  ;;  %v1708_v37 = vmul.f32 1.442695, %v4544_v2  ;;  %v4550_v62 = vsub.f32 %v4507_v20, %v3747_v11  ;;  %v4553_v20 = vsub.f32 %v3650_v61, %v3710_v4 }
 0x4d5   : > { %v2340_v38 = vpop.eup %2339  ;;  %2359 = vpow2.f32 %v1686_v63  ;;  %v1777_v21 = vpack.c.bf16 %v2338_v1, %v2336_v12  ;;  %v1704_v63 = vmul.f32 1.442695, %v4542_v29  ;;  %v4545_v1 = vsub.f32 %v3626_v16, %v3710_v4  ;;  %v4556_v29 = vld [vmem:[#allocation59_spill] sm:$0xff] }
 0x4d6   : > { %v2342_v14 = vpop.eup %2341  ;;  %2361 = vpow2.f32 %v1688_v52  ;;  %v1706_v52 = vmul.f32 1.442695, %v4543_v40  ;;  %v4548_v16 = vsub.f32 %v4506_v36, %v3747_v11  ;;  %v4551_v36 = vsub.f32 %v3644_v10, %v3710_v4 }
 0x4d7   : > { %v2344_v22 = vpop.eup %2343  ;;  %2363 = vpow2.f32 %v1690_v46  ;;  %1808 = vmatprep.subr.bf16.mxu1 %v1777_v21  ;;  %v1779_v0 = vpack.c.bf16 %v2342_v14, %v2340_v38  ;;  %v1710_v57 = vmul.f32 1.442695, %v4545_v1  ;;  %v1712_v38 = vmul.f32 1.442695, %v4546_v56  ;;  %v4561_v1 = vld [vmem:[#allocation69_spill] sm:$0xff] }
 0x4d8   : > { %v2346_v32 = vpop.eup %2345  ;;  %2365 = vpow2.f32 %v1692_v39  ;;  %1809 = vmatpush1.bf16.msra.mxu1 %v1776_v28  ;;  %v1716_v21 = vmul.f32 1.442695, %v4548_v16  ;;  %v1726_v41 = vmul.f32 1.442695, %v4553_v20  ;;  %v4555_v27 = vsub.f32 %v3656_v43, %v3710_v4 }
 0x4d9   : > { %v2348_v45 = vpop.eup %2347  ;;  %2367 = vpow2.f32 %v1694_v9  ;;  %1810 = vmatprep.subr.bf16.mxu1 %v1779_v0  ;;  %v1781_v54 = vpack.c.bf16 %v2346_v32, %v2344_v22  ;;  %v1714_v9 = vmul.f32 1.442695, %v4547_v7  ;;  %v4557_v61 = vsub.f32 %v4556_v29, %v3747_v11 }
 0x4da   : > { %v2350_v47 = vpop.eup %2349  ;;  %2369 = vpow2.f32 %v1696_v51  ;;  %v4549_v51 = vsub.f32 %v3638_v18, %v3710_v4  ;;  %v4552_v18 = vsub.f32 %v4508_v44, %v3747_v11  ;;  %v1730_v58 = vmul.f32 1.442695, %v4555_v27 }
 0x4db   : > { %v2352_v13 = vpop.eup %2351  ;;  %2371 = vpow2.f32 %v1698_v31  ;;  %v1783_v28 = vpack.c.bf16 %v2350_v47, %v2348_v45  ;;  %v1720_v31 = vmul.f32 1.442695, %v4550_v62  ;;  %v4560_v2 = vsub.f32 %v4511_v53, %v3747_v11 }
 0x4dc   : > { %v2354_v12 = vpop.eup %2353  ;;  %2373 = vpow2.f32 %v1700_v19  ;;  %1811 = vmatpush1.bf16.msra.mxu1 %v1778_v25  ;;  %v1718_v8 = vmul.f32 1.442695, %v4549_v51  ;;  %v1724_v42 = vmul.f32 1.442695, %v4552_v18  ;;  %v4562_v60 = vsub.f32 %v4561_v1, %v3710_v4  ;;  %v4573_v18 = vld [vmem:[#allocation64_spill] sm:$0xff] }
 0x4dd   : > { %v2356_v46 = vpop.eup %2355  ;;  %2375 = vpow2.f32 %v1702_v6  ;;  %1812 = vmatprep.subr.bf16.mxu1 %v1781_v54  ;;  %v1785_v35 = vpack.c.bf16 %v2354_v12, %v2352_v13  ;;  %v4554_v54 = vsub.f32 %v4509_v3, %v3747_v11  ;;  %v4558_v3 = vld [vmem:[#allocation61_spill] sm:$0xff] }
 0x4de   : > { %v2358_v39 = vpop.eup %2357  ;;  %2377 = vpow2.f32 %v1704_v63  ;;  %v1732_v63 = vmul.f32 1.442695, %v4557_v61  ;;  %v1738_v17 = vmul.f32 1.442695, %v4562_v60 }
 0x4df   : > { %v2360_v59 = vpop.eup %2359  ;;  %2379 = vpow2.f32 %v1706_v52  ;;  %v1728_v44 = vmul.f32 1.442695, %v4554_v54  ;;  %v4559_v52 = vsub.f32 %v4558_v3, %v3710_v4  ;;  %v4577_v54 = vsub.f32 %v4516_v49, %v3747_v11 }
 0x4e0   : > { %v2362_v25 = vpop.eup %2361  ;;  %2381 = vpow2.f32 %v1708_v37  ;;  %1813 = vmatpush1.bf16.msra.mxu1 %v1780_v24  ;;  %v1786_v14 = vpack.c.bf16 %v2360_v59, %v2356_v46  ;;  %v1722_v24 = vmul.f32 1.442695, %v4551_v36  ;;  %v1736_v37 = vmul.f32 1.442695, %v4560_v2 }
 0x4e1   : > { %v2364_v15 = vpop.eup %2363  ;;  %2383 = vpow2.f32 %v1710_v57  ;;  %1814 = vmatprep.subr.bf16.mxu1 %v1783_v28  ;;  %v1787_v22 = vpack.c.bf16 %v2362_v25, %v2358_v39  ;;  %v1734_v28 = vmul.f32 1.442695, %v4559_v52  ;;  %v4563_v57 = vsub.f32 %v4512_v50, %v3747_v11 }
 0x4e2   : > { %v2366_v55 = vpop.eup %2365  ;;  %2385 = vpow2.f32 %v1712_v38  ;;  %v4564_v38 = vld [vmem:[#allocation56_spill] sm:$0xff]  ;;  %v4566_v25 = vsub.f32 %v4513_v33, %v3747_v11 }
 0x4e3   : > { %v2368_v0 = vpop.eup %2367  ;;  %2387 = vpow2.f32 %v1714_v9  ;;  %v4565_v59 = vsub.f32 %v4564_v38, %v3710_v4 }
 0x4e4   : > { %v2370_v32 = vpop.eup %2369  ;;  %2389 = vpow2.f32 %v1716_v21  ;;  %1815 = vmatpush1.bf16.msra.mxu1 %v1782_v34  ;;  %v1788_v19 = vpack.c.bf16 %v2368_v0, %v2364_v15  ;;  %v1744_v16 = vmul.f32 1.442695, %v4566_v25  ;;  %v4567_v15 = vld [vmem:[#allocation60_spill] sm:$0xff]  ;;  %v4571_v0 = vld [vmem:[#allocation63_spill] sm:$0xff] }
 0x4e5   : > { %v2372_v45 = vpop.eup %2371  ;;  %2391 = vpow2.f32 %v1718_v8  ;;  %1816 = vmatprep.subr.bf16.mxu1 %v1785_v35  ;;  %v1789_v10 = vpack.c.bf16 %v2370_v32, %v2366_v55  ;;  %v1740_v35 = vmul.f32 1.442695, %v4563_v57  ;;  %v1742_v53 = vmul.f32 1.442695, %v4565_v59  ;;  %v4569_v8 = vld [vmem:[#allocation62_spill] sm:$0xff] }
 0x4e6   : > { %v2374_v6 = vpop.eup %2373  ;;  %2393 = vpow2.f32 %v1720_v31  ;;  %v4568_v50 = vsub.f32 %v4567_v15, %v3710_v4  ;;  %v4572_v36 = vsub.f32 %v4571_v0, %v3710_v4 }
 0x4e7   : > { %v2376_v47 = vpop.eup %2375  ;;  %2395 = vpow2.f32 %v1722_v24 }
 0x4e8   : > { %v2378_v34 = vpop.eup %2377  ;;  %2397 = vpow2.f32 %v1724_v42  ;;  %1817 = vmatpush1.bf16.msra.mxu1 %v1784_v5  ;;  %v1790_v13 = vpack.c.bf16 %v2376_v47, %v2372_v45  ;;  %v1750_v33 = vmul.f32 1.442695, %v4572_v36  ;;  %v4574_v42 = vsub.f32 %v4573_v18, %v3747_v11  ;;  %v4591_v36 = vld [vmem:[#allocation41_spill] sm:$0xff] }
 0x4e9   : > { %v2380_v40 = vpop.eup %2379  ;;  %2399 = vpow2.f32 %v1726_v41  ;;  %1818 = vmatprep.subr.bf16.mxu1 %v1787_v22  ;;  %v1791_v43 = vpack.c.bf16 %v2378_v34, %v2374_v6  ;;  %v4570_v22 = vsub.f32 %v4569_v8, %v3747_v11  ;;  %v4575_v41 = vld [vmem:[#allocation65_spill] sm:$0xff] }
 0x4ea   : > { %v2382_v12 = vpop.eup %2381  ;;  %2401 = vpow2.f32 %v1728_v44  ;;  %v1752_v45 = vmul.f32 1.442695, %v4574_v42  ;;  %v1756_v44 = vmul.f32 1.442695, %v4577_v54  ;;  %v4585_v8 = vld [vmem:[#allocation33_spill] sm:$0xff] }
 0x4eb   : > { %v2384_v46 = vpop.eup %2383  ;;  %2403 = vpow2.f32 %v1730_v58  ;;  %v1748_v55 = vmul.f32 1.442695, %v4570_v22  ;;  %v4578_v58 = vld [vmem:[#allocation68_spill] sm:$0xff] }
 0x4ec   : > { %v2386_v5 = vpop.eup %2385  ;;  %2405 = vpow2.f32 %v1732_v63  ;;  %1819 = vmatpush1.bf16.msra.mxu1 %v1786_v14  ;;  %v1792_v39 = vpack.c.bf16 %v2384_v46, %v2380_v40  ;;  %v1746_v14 = vmul.f32 1.442695, %v4568_v50  ;;  %v4579_v34 = vsub.f32 %v4578_v58, %v3710_v4 }
 0x4ed   : > { %v2388_v56 = vpop.eup %2387  ;;  %2407 = vpow2.f32 %v1734_v28  ;;  %1820 = vmatprep.subr.bf16.mxu1 %v1789_v10  ;;  %v1793_v7 = vpack.c.bf16 %v2386_v5, %v2382_v12  ;;  %v4576_v10 = vsub.f32 %v4575_v41, %v3710_v4  ;;  %v4580_v40 = vsub.f32 %v4517_v48, %v3747_v11  ;;  %v4581_v28 = vld [vmem:[#allocation8_spill] sm:$0xff] }
 0x4ee   : > { %v2390_v9 = vpop.eup %2389  ;;  %2409 = vpow2.f32 %v1736_v37  ;;  %v1758_v29 = vmul.f32 1.442695, %v4579_v34  ;;  %v4582_v49 = vsub.f32 %v4581_v28, %v3710_v4  ;;  %v4583_v12 = vsub.f32 %v3707_v23, %v3747_v11 }
 0x4ef   : > { %v2392_v21 = vpop.eup %2391  ;;  %2411 = vpow2.f32 %v1738_v17  ;;  %v1760_v3 = vmul.f32 1.442695, %v4580_v40 }
 0x4f0   : > { %v2394_v51 = vpop.eup %2393  ;;  %2413 = vpow2.f32 %v1740_v35  ;;  %1821 = vmatpush1.bf16.msra.mxu1 %v1788_v19  ;;  %v1794_v62 = vpack.c.bf16 %v2392_v21, %v2388_v56  ;;  %v1754_v19 = vmul.f32 1.442695, %v4576_v10  ;;  %v1764_v2 = vmul.f32 1.442695, %v4583_v12 }
 0x4f1   : > { %v2396_v31 = vpop.eup %2395  ;;  %2415 = vpow2.f32 %v1742_v53  ;;  %1822 = vmatprep.subr.bf16.mxu1 %v1791_v43  ;;  %v1795_v24 = vpack.c.bf16 %v2394_v51, %v2390_v9  ;;  %v4584_v51 = vld [vmem:[#allocation38_spill] sm:$0xff] }
 0x4f2   : > { %v2398_v32 = vpop.eup %2397  ;;  %2417 = vpow2.f32 %v1744_v16  ;;  %v4586_v22 = vpack.c.bf16 %v4584_v51, %v4585_v8 }
 0x4f3   : > { %v2400_v20 = vpop.eup %2399  ;;  %2419 = vpow2.f32 %v1746_v14  ;;  %v355_v14 = vpop.permute.xlu0 %354 }
 0x4f4   : > { %v2402_v6 = vpop.eup %2401  ;;  %2421 = vpow2.f32 %v1748_v55  ;;  %1823 = vmatpush1.bf16.msra.mxu1 %v1790_v13  ;;  %v1796_v47 = vpack.c.bf16 %v2400_v20, %v2396_v31  ;;  %v1762_v13 = vmul.f32 1.442695, %v4582_v49  ;;  %v4587_v55 = vld [vmem:[#allocation42_spill] sm:$0xff] }
 0x4f5   : > { %v2404_v27 = vpop.eup %2403  ;;  %2423 = vpow2.f32 %v1750_v33  ;;  %1824 = vmatprep.subr.bf16.mxu1 %v1793_v7  ;;  %v1797_v61 = vpack.c.bf16 %v2402_v6, %v2398_v32  ;;  %v4592_v33 = vld [vmem:[#allocation39_spill] sm:$0xff]  ;;  %v4594_v32 = vld [vmem:[#allocation18_spill] sm:$0xff] }
 0x4f6   : > { %v2406_v63 = vpop.eup %2405  ;;  %2425 = vpow2.f32 %v1752_v45  ;;  %v535_v18 = vadd.f32 %v4594_v32, %v355_v14 }
 0x4f7   : > { %v2408_v52 = vpop.eup %2407  ;;  %2427 = vpow2.f32 %v1754_v19 }
 0x4f8   : > { %v2410_v43 = vpop.eup %2409  ;;  %2429 = vpow2.f32 %v1756_v44  ;;  %1825 = vmatpush1.bf16.msra.mxu1 %v1792_v39  ;;  %v1798_v37 = vpack.c.bf16 %v2408_v52, %v2404_v27  ;;  %v1774_v42 = vpack.c.bf16 %v535_v18, %v535_v18 }
 0x4f9   : > { %v2412_v46 = vpop.eup %2411  ;;  %2431 = vpow2.f32 %v1758_v29  ;;  %1826 = vmatprep.subr.bf16.mxu1 %v1795_v24  ;;  %v1799_v1 = vpack.c.bf16 %v2410_v43, %v2406_v63  ;;  %v4593_v24 = vpack.c.bf16 %v4591_v36, %v4592_v33 }
 0x4fa   : > { %v2414_v48 = vpop.eup %2413  ;;  %2433 = vpow2.f32 %v1760_v3 }
 0x4fb   : > { %v2416_v60 = vpop.eup %2415  ;;  %2435 = vpow2.f32 %v1762_v13 }
 0x4fc   : > { %v2418_v17 = vpop.eup %2417  ;;  %2437 = vpow2.f32 %v1764_v2  ;;  %1827 = vmatpush1.bf16.msra.mxu1 %v1794_v62  ;;  %v1800_v4 = vpack.c.bf16 %v2416_v60, %v2412_v46 }
 0x4fd   : > { %v2420_v5 = vpop.eup %2419  ;;  %1828 = vmatprep.subr.bf16.mxu1 %v1797_v61  ;;  %v1801_v57 = vpack.c.bf16 %v2418_v17, %v2414_v48 }
 0x4fe   : > { %v2422_v35 = vpop.eup %2421 }
 0x4ff   : > { %v2424_v23 = vpop.eup %2423 }
 0x500   : > { %v2426_v11 = vpop.eup %2425  ;;  %1829 = vmatpush1.bf16.msra.mxu1 %v1796_v47  ;;  %v1802_v39 = vpack.c.bf16 %v2424_v23, %v2420_v5 }
 0x501   : > { %v2428_v56 = vpop.eup %2427  ;;  %1830 = vmatprep.subr.bf16.mxu1 %v1799_v1  ;;  %v1803_v38 = vpack.c.bf16 %v2426_v11, %v2422_v35 }
 0x502   : > { %v2430_v59 = vpop.eup %2429 }
 0x503   : > { %v2432_v53 = vpop.eup %2431 }
 0x504   : > { %v2434_v7 = vpop.eup %2433  ;;  %1831 = vmatpush1.bf16.msra.mxu1 %v1798_v37  ;;  %v1804_v9 = vpack.c.bf16 %v2432_v53, %v2428_v56 }
 0x505   : > { %v2436_v25 = vpop.eup %2435  ;;  %1832 = vmatprep.subr.bf16.mxu1 %v1801_v57  ;;  %v1805_v16 = vpack.c.bf16 %v2434_v7, %v2430_v59 }
 0x506   : > { %v2438_v21 = vpop.eup %2437  ;;  %v1806_v15 = vpack.c.bf16 %v3870_v30, %v2436_v25  ;;  %v4588_v30 = vld [vmem:[#allocation40_spill] sm:$0xff] }
 0x507   : > { %v1807_v50 = vpack.c.bf16 %v3872_v26, %v2438_v21  ;;  %v4589_v62 = vpack.c.bf16 %v4587_v55, %v4588_v30  ;;  %v4590_v26 = vld [vmem:[#allocation19_spill] sm:$0xff] }
 0x508   : > { %1833 = vmatpush1.bf16.msra.mxu1 %v1800_v4  ;;  %v537_v31 = vadd.f32 %v4590_v26, %v355_v14 }
 0x509   : > { %1834 = vmatprep.subr.bf16.mxu1 %v1803_v38 }
 0x50a   : > { %v1775_v0 = vpack.c.bf16 %v537_v31, %v537_v31 }
 0x50c   : > { %1835 = vmatpush1.bf16.msra.mxu1 %v1802_v39 }
 0x50d   : > { %1836 = vmatprep.subr.bf16.mxu1 %v1805_v16 }
 0x510   : > { %1837 = vmatpush1.bf16.msra.mxu1 %v1804_v9 }
 0x511   : > { %1838 = vmatprep.subr.bf16.mxu1 %v1807_v50 }
 0x514   : > { %1839 = vmatpush1.bf16.msra.mxu1 %v1806_v15 }
 0x517   : > { %1841 = vmatmul.mubr.bf16.vlgmr.msra.gmra.mrb[92].mxu1 %v4586_v22 }
 0x518   : > { %1850 = vmatprep.mubr.bf16.mxu1 %v4589_v62 }
 0x51f   : > { %1851 = vmatmul.mubr.bf16.gmra.mrb[96].mxu1 %v4593_v24 }
 0x520   : > { %1860 = vmatprep.mubr.bf16.mxu1 %v1775_v0 }
 0x527   : > { %1861 = vmatmul.mubr.bf16.gmra.mrb[100].mxu1 %v1774_v42 }
 0x528   : > { %2472 = shalt.err (!%p2469_p3)
}
 0x529   : > { %s2473_s30 = scalar_lea.hbm %s4058_s13, 1024  ;;  %s2477_s10 = scalar_lea.hbm %s4170_s4, 2048 }
 0x52a   : > { %p2474_p4 = scmp.ne.s32.totalorder %s4058_s13, %s2473_s30  ;;  %p2478_p9 = scmp.lt.u32.totalorder %s4058_s13, %s4170_s4 }
 0x52b   : > { %p2479_p10 = scmp.lt.u32.totalorder %s2477_s10, %s2473_s30  ;;  %p2481_p12 = scmp.lt.u32.totalorder %s2473_s30, %s4058_s13 }
 0x52c   : > { %p2475_p7 = pnand %p2474_p4, %p2629_p5 }
 0x52d   : > { %p2480_p11 = por %p2479_p10, %p2478_p9 }
 0x52e   : > { %p2476_p8 = pneg %p2475_p7 }
 0x52f   : > { %p2482_p13 = por %p2481_p12, %p2480_p11 }
 0x531   : > { %p2483_p0 = pnand %p2482_p13, %p2476_p8 }
 0x533   : > { %2486 = shalt.err (!%p2483_p0)
}
 0x534   : > { %s2558_s17 = smov 256   ;;  %s2559_s25 = smov 16   ;;  %v4595_v63 = vld [vmem:[#allocation43_spill] sm:$0xff]  ;;  %v2451_v46 = vld [vmem:[%s2654_s14] sm:$0xff]  ;;  %v2452_v48 = vld [vmem:[%s2654_s14 + $0x10] sm:$0xff] }
 0x535   : > { %2129 = dma.vmem_to_hbm [thread:$0]  (%p2629_p5), %s4061_s15, 1024, %s4058_s13, %s1904_s16, %s2558_s17, %s2558_s17, %s2559_s25  }
 0x536   : > { %s4094_s13 = scalar_lea.vmem [#allocation4], %s2048_s8  ;;  %v2453_v17 = vld [vmem:[%s2654_s14 + $0x20] sm:$0xff]  ;;  %v2454_v5 = vld [vmem:[%s2654_s14 + $0x30] sm:$0xff]  ;;  %v2455_v35 = vld [vmem:[%s2654_s14 + $0x8] sm:$0xff]  ;;  %s4110_s26 = scalar_lea.hbm %s4171_s5, %s2111_s11 }
 0x537   : > { %s1938_s15 = sshll.u32 %s4094_s13, 4  ;;  %v2456_v11 = vld [vmem:[%s2654_s14 + $0x18] sm:$0xff]  ;;  %v2457_v56 = vld [vmem:[%s2654_s14 + $0x28] sm:$0xff]  ;;  %s2560_s11 = smov [#allocation4]   ;;  %s4112_s15 = int_to_ptr.vmem [resolvable:$true] %s1938_s15 }
 0x538   : > { %v2458_v59 = vld [vmem:[%s2654_s14 + $0x38] sm:$0xff]  ;;  %s1909_s14 = scalar_lea.sflag [#allocation5], %s3501_s7  ;;  %s2487_s22 = scalar_lea.vmem %s4112_s15, 1024 }
 0x539   : > { %p2488_p1 = scmp.ne.s32.totalorder %s4112_s15, %s2487_s22  ;;  %s2491_s30 = sshll.u32 %s2560_s11, 4  ;;  %s2492_s30 = int_to_ptr.vmem [resolvable:$false] %s2491_s30 }
 0x53a   : > { %s2493_s6 = scalar_lea.vmem %s2492_s30, 2048  ;;  %p2494_p4 = scmp.lt.s32.totalorder %s4112_s15, %s2492_s30 }
 0x53b   : > { %p2489_p2 = pnand %p2488_p1, %p2629_p5  ;;  %p2495_p7 = scmp.lt.s32.totalorder %s2493_s6, %s2487_s22 }
 0x53d   : > { %p2490_p3 = pneg %p2489_p2  ;;  %p2496_p8 = por %p2495_p7, %p2494_p4 }
 0x53f   : > { %p2497_p9 = pnand %p2496_p8, %p2490_p3 }
 0x5ea   : > { %v1842_v45 = vpop.f32.mrb[92].mxu1 }
 0x5eb   : > { %v1844_v20 = vpop.f32.mrb[93].mxu1 }
 0x5ec   : > { %v1846_v41 = vpop.f32.mrb[94].mxu1 }
 0x5ed   : > { %v1848_v10 = vpop.f32.mrb[95].mxu1 }
 0x5f2   : > { %v1852_v19 = vpop.f32.mrb[96].mxu1 }
 0x5f3   : > { %v1854_v6 = vpop.f32.mrb[97].mxu1 }
 0x5f4   : > { %v1856_v54 = vpop.f32.mrb[98].mxu1 }
 0x5f5   : > { %v1858_v44 = vpop.f32.mrb[99].mxu1 }
 0x5fa   : > { %v1862_v47 = vpop.f32.mrb[100].mxu1 }
 0x5fb   : > { %2439 = vrcp.f32 %v1862_v47  ;;  %v1864_v27 = vpop.f32.mrb[101].mxu1 }
 0x5fc   : > { %2441 = vrcp.f32 %v1864_v27  ;;  %v1866_v58 = vpop.f32.mrb[102].mxu1 }
 0x5fd   : > { %v1867_v34 = vpop.f32.mrb[103].mxu1 }
 0x605   : > { %v2440_v29 = vpop.eup %2439 }
 0x606   : > { %v2442_v61 = vpop.eup %2441  ;;  %v1874_v40 = vrot.slane %v2440_v29, %v4595_v63 }
 0x607   : > { %v1878_v3 = vrot.slane %v2442_v61, %v4595_v63 }
 0x608   : > { %v1879_v52 = vmul.f32 %v1874_v40, %v1842_v45  ;;  %v1881_v28 = vmul.f32 %v1874_v40, %v1846_v41  ;;  %v1883_v49 = vmul.f32 %v1874_v40, %v1852_v19  ;;  %v1885_v13 = vmul.f32 %v1874_v40, %v1856_v54 }
 0x609   : > { %v1880_v43 = vmul.f32 %v1878_v3, %v1844_v20  ;;  %v1882_v12 = vmul.f32 %v1878_v3, %v1848_v10  ;;  %v1884_v2 = vmul.f32 %v1878_v3, %v1854_v6  ;;  %v1886_v37 = vmul.f32 %v1878_v3, %v1858_v44 }
 0x60a   : > { %v1887_v1 = vadd.f32 %v2451_v46, %v1879_v52  ;;  %v1889_v60 = vadd.f32 %v2452_v48, %v1881_v28  ;;  %v1891_v4 = vadd.f32 %v2453_v17, %v1883_v49  ;;  %v1893_v57 = vadd.f32 %v2454_v5, %v1885_v13 }
 0x60b   : > { %v1888_v23 = vadd.f32 %v2455_v35, %v1880_v43  ;;  %v1890_v39 = vadd.f32 %v2456_v11, %v1882_v12  ;;  %v1892_v38 = vadd.f32 %v2457_v56, %v1884_v2  ;;  %v1894_v53 = vadd.f32 %v2458_v59, %v1886_v37 }
 0x60c   : > { %1895 = vst [vmem:[%s4094_s13] sm:$0xff] %v1887_v1  ;;  %1897 = vst [vmem:[%s4094_s13 + $0x10] sm:$0xff] %v1889_v60 }
 0x60d   : > { %1899 = vst [vmem:[%s4094_s13 + $0x20] sm:$0xff] %v1891_v4  ;;  %1901 = vst [vmem:[%s4094_s13 + $0x30] sm:$0xff] %v1893_v57 }
 0x60e   : > { %1896 = vst [vmem:[%s4094_s13 + $0x8] sm:$0xff] %v1888_v23  ;;  %1898 = vst [vmem:[%s4094_s13 + $0x18] sm:$0xff] %v1890_v39 }
 0x60f   : > { %1900 = vst [vmem:[%s4094_s13 + $0x28] sm:$0xff] %v1892_v38  ;;  %1902 = vst [vmem:[%s4094_s13 + $0x38] sm:$0xff] %v1894_v53 }
 0x610   : > { %2500 = shalt.err (!%p2497_p9)
}
 0x611   : > { %s2501_s9 = scalar_lea.hbm %s4110_s26, 1024  ;;  %s2505_s23 = scalar_lea.hbm %s4171_s5, 2048 }
 0x612   : > { %p2502_p10 = scmp.ne.s32.totalorder %s4110_s26, %s2501_s9  ;;  %p2506_p13 = scmp.lt.u32.totalorder %s4110_s26, %s4171_s5 }
 0x613   : > { %p2507_p0 = scmp.lt.u32.totalorder %s2505_s23, %s2501_s9  ;;  %p2509_p2 = scmp.lt.u32.totalorder %s2501_s9, %s4110_s26 }
 0x614   : > { %p2503_p11 = pnand %p2502_p10, %p2629_p5 }
 0x615   : > { %p2508_p1 = por %p2507_p0, %p2506_p13 }
 0x616   : > { %p2504_p12 = pneg %p2503_p11 }
 0x617   : > { %p2510_p3 = por %p2509_p2, %p2508_p1 }
 0x619   : > { %p2511_p4 = pnand %p2510_p3, %p2504_p12 }
 0x61b   : > { %2514 = shalt.err (!%p2511_p4)
}
 0x61c   : > { %2130 = dma.vmem_to_hbm [thread:$0]  (%p2629_p5), %s4112_s15, 1024, %s4110_s26, %s1909_s14, %s2558_s17, %s2558_s17, %s2559_s25  }
 0x61d PF: > { %p2140_p7 = scmp.ge.s32.totalorder %s2553_s21, 2  ;;  %s1953_s16 = sand.u32 1, %s2541_s18  }
 0x61e   : > { %s1954_s22 = scalar_lea.sflag [#allocation3], %s1953_s16 }
 0x61f   : > { %p2134_p8 = pnand %p2140_p7, %p2633_p6 }
 0x621   : > { %2532 = dma.done.wait (!%p2134_p8), %s1954_s22, 1024  }
 0x622   : > { %2534 = vsyncadd (!%p2134_p8), %s1954_s22, 4294966272  ;;  %s1963_s28 = scalar_lea.sflag [#allocation5], %s1953_s16 }
 0x623   : > { %2536 = dma.done.wait (!%p2134_p8), %s1963_s28, 1024  }
 0x624   : > { %2538 = vsyncadd (!%p2134_p8), %s1963_s28, 4294966272  ;;  %p19_p5 = scmp.ge.s32.totalorder %s2616_s24, 4   ;;  %s4596_s18 = smov %s2545_s19 }
 0x625   : > { %s4597_s19 = smov %s2549_s20  ;;  %s4598_s20 = smov %s2627_s27 }
 0x626   : > { %s4599_s21 = smov %s2616_s24  ;;  %21 = sbr.rel (!%p19_p5) target bundleno = 5 (0x5), region = 91 }
 0x62d   :  { %1968 = vsyncpa [#allocation3], 1 }
 0x62e   :  { %1970 = vsyncpa [#allocation3 + $0x1], 1 }
 0x62f   :  { %1971 = vsyncpa [#allocation5], 1 }
 0x630   :  { %1973 = vsyncpa [#allocation5 + $0x1], 1 }

</bundles_post_ra>
